<compile_context>
chip_gen: v7x
topology: tpu7x:2x2x1
jax: 0.10.0
libtpu: 0.0.40
codegen_flags: <defaults>
</compile_context>

<pallas_src>
import functools

import jax
import jax.numpy as jnp
from jax.experimental import pallas as pl
from jax.experimental.pallas import tpu as pltpu


def _round_up(x, m):
    return ((x + m - 1) // m) * m


@functools.lru_cache(maxsize=1)
def _gate_dtype():
    """bf16 gate math on v6e/v7x (bf16 VPU/EUP paths); f32 on v5e / unknown."""
    try:
        kind = jax.devices()[0].device_kind.lower()
    except Exception:
        return jnp.float32
    if "v6" in kind or "v7" in kind:
        return jnp.bfloat16
    return jnp.float32


# ----------------------------------------------------------------------------
# Fused Pallas kernel: num_layers LSTM layers + output Linear
# ----------------------------------------------------------------------------
def decoder_fused_kernel(x_ref, wih_ref, whh_ref, b_ref, wfc_ref, bfc_ref,
                         out_ref, hN_ref,
                         pg_sc, y_sc, *, gate_dtype):
    """Fused multi-layer LSTM (zero init state) + fc, time-major layout.

    x_ref  : (S*Bp, H)   bf16  time-major flattened input (batch padded to 8)
    wih_ref: (L, H, 4H)  bf16  input->gates weights (pre-transposed, PyTorch i,f,g,o)
    whh_ref: (L, H, 4H)  bf16  hidden->gates weights (pre-transposed)
    b_ref  : (L, 1, 4H)  f32   b_ih + b_hh
    wfc_ref: (H, Op)     bf16  fc weight (pre-transposed, lane-padded to 128)
    bfc_ref: (1, Op)     f32   fc bias (lane-padded)
    out_ref: (S*Bp, Op)  f32   fc(lstm output), time-major flat, lane-dense
    hN_ref : (L, Bp, H)  f32   last hidden state per layer
    pg_sc  : (S*Bp, 4H)  f32   scratch: hoisted input-projection pre-gates
    y_sc   : (S*Bp, H)   bf16  scratch: current layer's per-step hidden outputs
    """
    SB, H = x_ref.shape
    L = wih_ref.shape[0]
    Bp = hN_ref.shape[1]
    S = SB // Bp
    H4 = 4 * H

    # Hoisted lane mask selecting the g-gate (tanh) block of the fused (Bp, 4H)
    # gate vreg; the i/f/o lanes take sigmoid. Built once, reused every step.
    lane = jax.lax.broadcasted_iota(jnp.int32, (Bp, H4), 1)
    g_lanes = jnp.logical_and(lane >= 2 * H, lane < 3 * H)

    for l in range(L):                       # static: unrolled over layers
        # ---- loop-invariant loads hoisted out of the recurrence -------------
        wih = wih_ref[l]                     # (H, 4H) bf16
        whh = whh_ref[l]                     # (H, 4H) bf16
        bias = b_ref[l]                      # (1, 4H) f32

        x_l = x_ref[...] if l == 0 else y_sc[...]        # bf16 either way

        # ---- hoisted input projection: one large MXU matmul for ALL steps ---
        pg_sc[...] = jnp.dot(x_l, wih,
                             preferred_element_type=jnp.float32) + bias

        # ---- serial recurrence: only h @ W_hh stays on the critical path ----
        h = jnp.zeros((Bp, H), jnp.bfloat16)
        c = jnp.zeros((Bp, H), jnp.float32)
        h_f32 = jnp.zeros((Bp, H), jnp.float32)
        # TODO(synk): lax.fori_loop(..., unroll=4..8) once S grows beyond ~16.
        for t in range(S):                   # fully unrolled (S static, small)
            g = (pg_sc[t * Bp:(t + 1) * Bp, :]
                 + jnp.dot(h, whh, preferred_element_type=jnp.float32))
            g = g.astype(gate_dtype)
            # Two full-vreg EUP passes + one lane select instead of four
            # 32-lane sub-slice nonlinearities per step.
            sig = jax.nn.sigmoid(g)
            tnh = jnp.tanh(g)
            act = jnp.where(g_lanes, tnh, sig)           # (Bp, 4H)
            i_g = act[:, 0:H]
            f_g = act[:, H:2 * H]
            g_g = act[:, 2 * H:3 * H]
            o_g = act[:, 3 * H:4 * H]
            c = f_g * c + i_g * g_g                      # carries stay f32
            h_f32 = o_g.astype(jnp.float32) * jnp.tanh(c)
            h = h_f32.astype(jnp.bfloat16)
            y_sc[t * Bp:(t + 1) * Bp, :] = h

        hN_ref[l] = h_f32
        # NOTE: inter-layer dropout is a no-op in eval mode (matches the PyTorch
        # forward); training-mode dropout is intentionally not implemented.

    # ---- fused output Linear (LSTM output never leaves VMEM), lane-dense ----
    out = jnp.dot(y_sc[...], wfc_ref[...],
                  preferred_element_type=jnp.float32) + bfc_ref[...]
    out_ref[...] = out.astype(out_ref.dtype)


# ----------------------------------------------------------------------------
# Wrapper
# ----------------------------------------------------------------------------
_VMEM = pl.BlockSpec(memory_space=pltpu.MemorySpace.VMEM)


@jax.jit
def decoder_forward(z, params):
    """z: (B, S, H) -> (dec_out (B, S, O), hidden_state (L, B, H))."""
    B, S, H = z.shape
    L = params["wih"].shape[0]
    O = params["w_fc_t"].shape[1]
    Bp = _round_up(B, 8)        # 8-sublane alignment for all per-step slices
    Op = _round_up(O, 128)      # lane-dense fc matmul + unmasked output stores

    # Cast to bf16 BEFORE the layout shuffle (halves that mem-bound copy), pad
    # the batch to the sublane tile, then batch_first -> time-major flat.
    x = z.astype(jnp.bfloat16)
    if Bp != B:
        x = jnp.pad(x, ((0, Bp - B), (0, 0), (0, 0)))
    x_tm = jnp.transpose(x, (1, 0, 2)).reshape(S * Bp, H)

    # Lane-pad fc weight/bias so the kernel output is lane-dense (O < 128 would
    # force masked vst.msk partial stores and a ~3% N-occupancy MXU matmul).
    w_fc = params["w_fc_t"]
    b_fc = params["b_fc"]
    if Op != O:
        w_fc = jnp.pad(w_fc, ((0, 0), (0, Op - O)))
        b_fc = jnp.pad(b_fc, ((0, 0), (0, Op - O)))

    # VMEM budget from the actual footprint (2x margin, 2 MiB floor, 128 MiB cap)
    # instead of a blanket 32 MiB ask.
    ins = (x_tm, params["wih"], params["whh"], params["b"], w_fc, b_fc)
    in_bytes = sum(a.size * a.dtype.itemsize for a in ins)
    out_bytes = S * Bp * Op * 4 + L * Bp * H * 4
    scratch_bytes = S * Bp * 4 * H * 4 + S * Bp * H * 2
    vmem_bytes = min(max(2 << 20,
                         _round_up(2 * (in_bytes + out_bytes + scratch_bytes),
                                   1 << 20)),
                     128 << 20)

    kernel = functools.partial(decoder_fused_kernel, gate_dtype=_gate_dtype())

    out_flat, h_n = pl.pallas_call(
        kernel,
        out_shape=(jax.ShapeDtypeStruct((S * Bp, Op), jnp.float32),
                   jax.ShapeDtypeStruct((L, Bp, H), jnp.float32)),
        in_specs=[_VMEM] * 6,
        out_specs=(_VMEM, _VMEM),
        scratch_shapes=[pltpu.VMEM((S * Bp, 4 * H), jnp.float32),
                        pltpu.VMEM((S * Bp, H), jnp.bfloat16)],
        compiler_params=pltpu.CompilerParams(vmem_limit_bytes=int(vmem_bytes)),
    )(*ins)

    # Undo layout padding: time-major flat -> batch_first, drop padded rows/lanes.
    dec_out = jnp.transpose(out_flat.reshape(S, Bp, Op), (1, 0, 2))[:B, :, :O]
    return dec_out, h_n[:, :B, :]


# ----------------------------------------------------------------------------
# Params + pure-JAX reference
# ----------------------------------------------------------------------------
def init_decoder_params(key, input_size, hidden_size, num_layers):
    """Deterministic init matching PyTorch default shapes / uniform ranges.

    Weights are stored pre-transposed and stacked per layer:
      wih, whh: (L, H, 4H) bf16   b: (L, 1, 4H) f32 (= b_ih + b_hh)
      w_fc_t:   (H, input_size) bf16   b_fc: (1, input_size) f32
    """
    H = hidden_size
    k = 1.0 / jnp.sqrt(jnp.float32(H))
    keys = jax.random.split(key, 4 * num_layers + 2)
    wih, whh, b = [], [], []
    for l in range(num_layers):
        k0, k1, k2, k3 = keys[4 * l:4 * l + 4]
        # LSTM input size == hidden_size for every layer in this module.
        w_ih = jax.random.uniform(k0, (4 * H, H), jnp.float32, -k, k)
        w_hh = jax.random.uniform(k1, (4 * H, H), jnp.float32, -k, k)
        b_ih = jax.random.uniform(k2, (4 * H,), jnp.float32, -k, k)
        b_hh = jax.random.uniform(k3, (4 * H,), jnp.float32, -k, k)
        wih.append(w_ih.T)                          # (H, 4H)
        whh.append(w_hh.T)                          # (H, 4H)
        b.append((b_ih + b_hh).reshape(1, 4 * H))
    w_fc = jax.random.uniform(keys[-2], (input_size, H), jnp.float32, -k, k)
    b_fc = jax.random.uniform(keys[-1], (input_size,), jnp.float32, -k, k)
    return {
        "wih": jnp.stack(wih).astype(jnp.bfloat16),     # (L, H, 4H)
        "whh": jnp.stack(whh).astype(jnp.bfloat16),     # (L, H, 4H)
        "b": jnp.stack(b),                              # (L, 1, 4H) f32
        "w_fc_t": w_fc.T.astype(jnp.bfloat16),          # (H, input_size)
        "b_fc": b_fc.reshape(1, input_size),            # (1, input_size) f32
    }


def decoder_reference(z, params):
    """Pure-JAX f32 reference on the same (bf16-rounded) weights."""
    B, S, H = z.shape
    L = params["wih"].shape[0]
    x = z.astype(jnp.float32)
    wih = params["wih"].astype(jnp.float32)
    whh = params["whh"].astype(jnp.float32)
    b = params["b"]
    h_last = []
    for l in range(L):
        h = jnp.zeros((B, H), jnp.float32)
        c = jnp.zeros((B, H), jnp.float32)
        ys = []
        for t in range(S):
            g = x[:, t, :] @ wih[l] + h @ whh[l] + b[l]
            i = jax.nn.sigmoid(g[:, 0:H])
            f = jax.nn.sigmoid(g[:, H:2 * H])
            gg = jnp.tanh(g[:, 2 * H:3 * H])
            o = jax.nn.sigmoid(g[:, 3 * H:4 * H])
            c = f * c + i * gg
            h = o * jnp.tanh(c)
            ys.append(h)
        x = jnp.stack(ys, axis=1)
        h_last.append(h)
    dec = x @ params["w_fc_t"].astype(jnp.float32) + params["b_fc"]
    return dec, jnp.stack(h_last)


# ----------------------------------------------------------------------------
if __name__ == "__main__":
    input_size = 4
    hidden_size = 32
    num_layers = 2
    batch, seq = 2, 8

    key = jax.random.PRNGKey(0)
    k_params, k_z = jax.random.split(key)
    params = init_decoder_params(k_params, input_size, hidden_size, num_layers)

    # Decoder input z has feature dim == hidden_size (nn.LSTM input_size=hidden_size).
    z = jax.random.normal(k_z, (batch, seq, hidden_size), jnp.float32)

    dec_out, hidden_state = decoder_forward(z, params)
    jax.block_until_ready((dec_out, hidden_state))

    assert dec_out.shape == (batch, seq, input_size)
    assert hidden_state.shape == (num_layers, batch, hidden_size)

    # Relaxed-tolerance check vs. the pure-JAX reference (bf16 activations/gates).
    ref_out, ref_hid = decoder_reference(z, params)
    assert float(jnp.max(jnp.abs(dec_out - ref_out))) < 7.5e-2
    assert float(jnp.max(jnp.abs(hidden_state - ref_hid))) < 7.5e-2

    print("KERNEL_OK")
</pallas_src>

<mosaic_0001>
module attributes {stable_mosaic.version = 11 : i64} {
  func.func @decoder_fused_kernel(%arg0: memref<64x32xbf16, #tpu.memory_space<vmem>>, %arg1: memref<2x32x128xbf16, #tpu.memory_space<vmem>>, %arg2: memref<2x32x128xbf16, #tpu.memory_space<vmem>>, %arg3: memref<2x1x128xf32, #tpu.memory_space<vmem>>, %arg4: memref<32x128xbf16, #tpu.memory_space<vmem>>, %arg5: memref<1x128xf32, #tpu.memory_space<vmem>>, %arg6: memref<64x128xf32, #tpu.memory_space<vmem>>, %arg7: memref<2x8x32xf32, #tpu.memory_space<vmem>>, %arg8: memref<64x128xf32, #tpu.memory_space<vmem>>, %arg9: memref<64x32xbf16, #tpu.memory_space<vmem>>) attributes {dimension_semantics = [], scalar_prefetch = 0 : i64, scratch_operands = 2 : i64, tpu.core_type = #tpu.core_type<tc>} {
    %0 = tpu.iota {dimensions = array<i32: 1>} : vector<8x128xi32>
    %c64_i32 = arith.constant 64 : i32
    %1 = vector.broadcast %c64_i32 : i32 to vector<8x128xi32>
    %2 = arith.cmpi sge, %0, %1 : vector<8x128xi32>
    %c96_i32 = arith.constant 96 : i32
    %3 = vector.broadcast %c96_i32 : i32 to vector<8x128xi32>
    %4 = arith.cmpi slt, %0, %3 : vector<8x128xi32>
    %5 = arith.andi %2, %4 : vector<8x128xi1>
    %c0 = arith.constant 0 : index
    %c0_0 = arith.constant 0 : index
    %c0_1 = arith.constant 0 : index
    %6 = vector.load %arg1[%c0, %c0_0, %c0_1] : memref<2x32x128xbf16, #tpu.memory_space<vmem>>, vector<1x32x128xbf16>
    %7 = vector.shape_cast %6 : vector<1x32x128xbf16> to vector<32x128xbf16>
    %c0_2 = arith.constant 0 : index
    %c0_3 = arith.constant 0 : index
    %c0_4 = arith.constant 0 : index
    %8 = vector.load %arg2[%c0_2, %c0_3, %c0_4] : memref<2x32x128xbf16, #tpu.memory_space<vmem>>, vector<1x32x128xbf16>
    %9 = vector.shape_cast %8 : vector<1x32x128xbf16> to vector<32x128xbf16>
    %c0_5 = arith.constant 0 : index
    %c0_6 = arith.constant 0 : index
    %c0_7 = arith.constant 0 : index
    %10 = vector.load %arg3[%c0_5, %c0_6, %c0_7] : memref<2x1x128xf32, #tpu.memory_space<vmem>>, vector<1x1x128xf32>
    %11 = vector.shape_cast %10 : vector<1x1x128xf32> to vector<1x128xf32>
    %c0_8 = arith.constant 0 : index
    %c0_9 = arith.constant 0 : index
    %12 = vector.load %arg0[%c0_8, %c0_9] : memref<64x32xbf16, #tpu.memory_space<vmem>>, vector<64x32xbf16>
    %cst = arith.constant dense<0.000000e+00> : vector<64x128xf32>
    %13 = tpu.matmul %12, %7, %cst {dimension_numbers = #tpu.dot_dimension_numbers<[1], [0], [0], [1], [0, 0, 1, 1], [], []>} : vector<64x32xbf16>, vector<32x128xbf16>, vector<64x128xf32> -> vector<64x128xf32>
    %14 = vector.broadcast %11 : vector<1x128xf32> to vector<64x128xf32>
    %15 = arith.addf %13, %14 : vector<64x128xf32>
    %c0_10 = arith.constant 0 : index
    %c0_11 = arith.constant 0 : index
    %16 = vector.load %arg8[%c0_10, %c0_11] : memref<64x128xf32, #tpu.memory_space<vmem>>, vector<64x128xf32>
    tpu.vector_store %arg8[%c0_10, %c0_11], %15 {strides = array<i32>} : memref<64x128xf32, #tpu.memory_space<vmem>>, vector<64x128xf32>,
    %cst_12 = arith.constant 0.000000e+00 : bf16
    %17 = vector.broadcast %cst_12 : bf16 to vector<8x32xbf16>
    %cst_13 = arith.constant 0.000000e+00 : f32
    %18 = vector.broadcast %cst_13 : f32 to vector<8x32xf32>
    %c0_14 = arith.constant 0 : index
    %c0_15 = arith.constant 0 : index
    %19 = vector.load %arg8[%c0_14, %c0_15] : memref<64x128xf32, #tpu.memory_space<vmem>>, vector<8x128xf32>
    %cst_16 = arith.constant dense<0.000000e+00> : vector<8x128xf32>
    %20 = tpu.matmul %17, %9, %cst_16 {dimension_numbers = #tpu.dot_dimension_numbers<[1], [0], [0], [1], [0, 0, 1, 1], [], []>} : vector<8x32xbf16>, vector<32x128xbf16>, vector<8x128xf32> -> vector<8x128xf32>
    %21 = arith.addf %19, %20 : vector<8x128xf32>
    %22 = arith.negf %21 : vector<8x128xf32>
    %23 = math.exp %22 : vector<8x128xf32>
    %cst_17 = arith.constant 1.000000e+00 : f32
    %24 = vector.broadcast %cst_17 : f32 to vector<8x128xf32>
    %25 = arith.addf %24, %23 : vector<8x128xf32>
    %26 = arith.divf %24, %25 : vector<8x128xf32>
    %27 = math.tanh %21 : vector<8x128xf32>
    %28 = arith.select %5, %27, %26 : vector<8x128xi1>, vector<8x128xf32>
    %29 = vector.extract_strided_slice %28 {offsets = [0, 0], sizes = [8, 32], strides = [1, 1]} : vector<8x128xf32> to vector<8x32xf32>
    %30 = vector.extract_strided_slice %28 {offsets = [0, 32], sizes = [8, 32], strides = [1, 1]} : vector<8x128xf32> to vector<8x32xf32>
    %31 = vector.extract_strided_slice %28 {offsets = [0, 64], sizes = [8, 32], strides = [1, 1]} : vector<8x128xf32> to vector<8x32xf32>
    %32 = vector.extract_strided_slice %28 {offsets = [0, 96], sizes = [8, 32], strides = [1, 1]} : vector<8x128xf32> to vector<8x32xf32>
    %33 = arith.mulf %30, %18 : vector<8x32xf32>
    %34 = arith.mulf %29, %31 : vector<8x32xf32>
    %35 = arith.addf %33, %34 : vector<8x32xf32>
    %36 = math.tanh %35 : vector<8x32xf32>
    %37 = arith.mulf %32, %36 : vector<8x32xf32>
    %38 = arith.truncf %37 : vector<8x32xf32> to vector<8x32xbf16>
    %c0_18 = arith.constant 0 : index
    %c0_19 = arith.constant 0 : index
    %39 = vector.load %arg9[%c0_18, %c0_19] : memref<64x32xbf16, #tpu.memory_space<vmem>>, vector<8x32xbf16>
    tpu.vector_store %arg9[%c0_18, %c0_19], %38 {strides = array<i32>} : memref<64x32xbf16, #tpu.memory_space<vmem>>, vector<8x32xbf16>,
    %c8 = arith.constant 8 : index
    %c0_20 = arith.constant 0 : index
    %40 = vector.load %arg8[%c8, %c0_20] : memref<64x128xf32, #tpu.memory_space<vmem>>, vector<8x128xf32>
    %cst_21 = arith.constant dense<0.000000e+00> : vector<8x128xf32>
    %41 = tpu.matmul %38, %9, %cst_21 {dimension_numbers = #tpu.dot_dimension_numbers<[1], [0], [0], [1], [0, 0, 1, 1], [], []>} : vector<8x32xbf16>, vector<32x128xbf16>, vector<8x128xf32> -> vector<8x128xf32>
    %42 = arith.addf %40, %41 : vector<8x128xf32>
    %43 = arith.negf %42 : vector<8x128xf32>
    %44 = math.exp %43 : vector<8x128xf32>
    %cst_22 = arith.constant 1.000000e+00 : f32
    %45 = vector.broadcast %cst_22 : f32 to vector<8x128xf32>
    %46 = arith.addf %45, %44 : vector<8x128xf32>
    %47 = arith.divf %45, %46 : vector<8x128xf32>
    %48 = math.tanh %42 : vector<8x128xf32>
    %49 = arith.select %5, %48, %47 : vector<8x128xi1>, vector<8x128xf32>
    %50 = vector.extract_strided_slice %49 {offsets = [0, 0], sizes = [8, 32], strides = [1, 1]} : vector<8x128xf32> to vector<8x32xf32>
    %51 = vector.extract_strided_slice %49 {offsets = [0, 32], sizes = [8, 32], strides = [1, 1]} : vector<8x128xf32> to vector<8x32xf32>
    %52 = vector.extract_strided_slice %49 {offsets = [0, 64], sizes = [8, 32], strides = [1, 1]} : vector<8x128xf32> to vector<8x32xf32>
    %53 = vector.extract_strided_slice %49 {offsets = [0, 96], sizes = [8, 32], strides = [1, 1]} : vector<8x128xf32> to vector<8x32xf32>
    %54 = arith.mulf %51, %35 : vector<8x32xf32>
    %55 = arith.mulf %50, %52 : vector<8x32xf32>
    %56 = arith.addf %54, %55 : vector<8x32xf32>
    %57 = math.tanh %56 : vector<8x32xf32>
    %58 = arith.mulf %53, %57 : vector<8x32xf32>
    %59 = arith.truncf %58 : vector<8x32xf32> to vector<8x32xbf16>
    %c8_23 = arith.constant 8 : index
    %c0_24 = arith.constant 0 : index
    %60 = vector.load %arg9[%c8_23, %c0_24] : memref<64x32xbf16, #tpu.memory_space<vmem>>, vector<8x32xbf16>
    tpu.vector_store %arg9[%c8_23, %c0_24], %59 {strides = array<i32>} : memref<64x32xbf16, #tpu.memory_space<vmem>>, vector<8x32xbf16>,
    %c16 = arith.constant 16 : index
    %c0_25 = arith.constant 0 : index
    %61 = vector.load %arg8[%c16, %c0_25] : memref<64x128xf32, #tpu.memory_space<vmem>>, vector<8x128xf32>
    %cst_26 = arith.constant dense<0.000000e+00> : vector<8x128xf32>
    %62 = tpu.matmul %59, %9, %cst_26 {dimension_numbers = #tpu.dot_dimension_numbers<[1], [0], [0], [1], [0, 0, 1, 1], [], []>} : vector<8x32xbf16>, vector<32x128xbf16>, vector<8x128xf32> -> vector<8x128xf32>
    %63 = arith.addf %61, %62 : vector<8x128xf32>
    %64 = arith.negf %63 : vector<8x128xf32>
    %65 = math.exp %64 : vector<8x128xf32>
    %cst_27 = arith.constant 1.000000e+00 : f32
    %66 = vector.broadcast %cst_27 : f32 to vector<8x128xf32>
    %67 = arith.addf %66, %65 : vector<8x128xf32>
    %68 = arith.divf %66, %67 : vector<8x128xf32>
    %69 = math.tanh %63 : vector<8x128xf32>
    %70 = arith.select %5, %69, %68 : vector<8x128xi1>, vector<8x128xf32>
    %71 = vector.extract_strided_slice %70 {offsets = [0, 0], sizes = [8, 32], strides = [1, 1]} : vector<8x128xf32> to vector<8x32xf32>
    %72 = vector.extract_strided_slice %70 {offsets = [0, 32], sizes = [8, 32], strides = [1, 1]} : vector<8x128xf32> to vector<8x32xf32>
    %73 = vector.extract_strided_slice %70 {offsets = [0, 64], sizes = [8, 32], strides = [1, 1]} : vector<8x128xf32> to vector<8x32xf32>
    %74 = vector.extract_strided_slice %70 {offsets = [0, 96], sizes = [8, 32], strides = [1, 1]} : vector<8x128xf32> to vector<8x32xf32>
    %75 = arith.mulf %72, %56 : vector<8x32xf32>
    %76 = arith.mulf %71, %73 : vector<8x32xf32>
    %77 = arith.addf %75, %76 : vector<8x32xf32>
    %78 = math.tanh %77 : vector<8x32xf32>
    %79 = arith.mulf %74, %78 : vector<8x32xf32>
    %80 = arith.truncf %79 : vector<8x32xf32> to vector<8x32xbf16>
    %c16_28 = arith.constant 16 : index
    %c0_29 = arith.constant 0 : index
    %81 = vector.load %arg9[%c16_28, %c0_29] : memref<64x32xbf16, #tpu.memory_space<vmem>>, vector<8x32xbf16>
    tpu.vector_store %arg9[%c16_28, %c0_29], %80 {strides = array<i32>} : memref<64x32xbf16, #tpu.memory_space<vmem>>, vector<8x32xbf16>,
    %c24 = arith.constant 24 : index
    %c0_30 = arith.constant 0 : index
    %82 = vector.load %arg8[%c24, %c0_30] : memref<64x128xf32, #tpu.memory_space<vmem>>, vector<8x128xf32>
    %cst_31 = arith.constant dense<0.000000e+00> : vector<8x128xf32>
    %83 = tpu.matmul %80, %9, %cst_31 {dimension_numbers = #tpu.dot_dimension_numbers<[1], [0], [0], [1], [0, 0, 1, 1], [], []>} : vector<8x32xbf16>, vector<32x128xbf16>, vector<8x128xf32> -> vector<8x128xf32>
    %84 = arith.addf %82, %83 : vector<8x128xf32>
    %85 = arith.negf %84 : vector<8x128xf32>
    %86 = math.exp %85 : vector<8x128xf32>
    %cst_32 = arith.constant 1.000000e+00 : f32
    %87 = vector.broadcast %cst_32 : f32 to vector<8x128xf32>
    %88 = arith.addf %87, %86 : vector<8x128xf32>
    %89 = arith.divf %87, %88 : vector<8x128xf32>
    %90 = math.tanh %84 : vector<8x128xf32>
    %91 = arith.select %5, %90, %89 : vector<8x128xi1>, vector<8x128xf32>
    %92 = vector.extract_strided_slice %91 {offsets = [0, 0], sizes = [8, 32], strides = [1, 1]} : vector<8x128xf32> to vector<8x32xf32>
    %93 = vector.extract_strided_slice %91 {offsets = [0, 32], sizes = [8, 32], strides = [1, 1]} : vector<8x128xf32> to vector<8x32xf32>
    %94 = vector.extract_strided_slice %91 {offsets = [0, 64], sizes = [8, 32], strides = [1, 1]} : vector<8x128xf32> to vector<8x32xf32>
    %95 = vector.extract_strided_slice %91 {offsets = [0, 96], sizes = [8, 32], strides = [1, 1]} : vector<8x128xf32> to vector<8x32xf32>
    %96 = arith.mulf %93, %77 : vector<8x32xf32>
    %97 = arith.mulf %92, %94 : vector<8x32xf32>
    %98 = arith.addf %96, %97 : vector<8x32xf32>
    %99 = math.tanh %98 : vector<8x32xf32>
    %100 = arith.mulf %95, %99 : vector<8x32xf32>
    %101 = arith.truncf %100 : vector<8x32xf32> to vector<8x32xbf16>
    %c24_33 = arith.constant 24 : index
    %c0_34 = arith.constant 0 : index
    %102 = vector.load %arg9[%c24_33, %c0_34] : memref<64x32xbf16, #tpu.memory_space<vmem>>, vector<8x32xbf16>
    tpu.vector_store %arg9[%c24_33, %c0_34], %101 {strides = array<i32>} : memref<64x32xbf16, #tpu.memory_space<vmem>>, vector<8x32xbf16>,
    %c32 = arith.constant 32 : index
    %c0_35 = arith.constant 0 : index
    %103 = vector.load %arg8[%c32, %c0_35] : memref<64x128xf32, #tpu.memory_space<vmem>>, vector<8x128xf32>
    %cst_36 = arith.constant dense<0.000000e+00> : vector<8x128xf32>
    %104 = tpu.matmul %101, %9, %cst_36 {dimension_numbers = #tpu.dot_dimension_numbers<[1], [0], [0], [1], [0, 0, 1, 1], [], []>} : vector<8x32xbf16>, vector<32x128xbf16>, vector<8x128xf32> -> vector<8x128xf32>
    %105 = arith.addf %103, %104 : vector<8x128xf32>
    %106 = arith.negf %105 : vector<8x128xf32>
    %107 = math.exp %106 : vector<8x128xf32>
    %cst_37 = arith.constant 1.000000e+00 : f32
    %108 = vector.broadcast %cst_37 : f32 to vector<8x128xf32>
    %109 = arith.addf %108, %107 : vector<8x128xf32>
    %110 = arith.divf %108, %109 : vector<8x128xf32>
    %111 = math.tanh %105 : vector<8x128xf32>
    %112 = arith.select %5, %111, %110 : vector<8x128xi1>, vector<8x128xf32>
    %113 = vector.extract_strided_slice %112 {offsets = [0, 0], sizes = [8, 32], strides = [1, 1]} : vector<8x128xf32> to vector<8x32xf32>
    %114 = vector.extract_strided_slice %112 {offsets = [0, 32], sizes = [8, 32], strides = [1, 1]} : vector<8x128xf32> to vector<8x32xf32>
    %115 = vector.extract_strided_slice %112 {offsets = [0, 64], sizes = [8, 32], strides = [1, 1]} : vector<8x128xf32> to vector<8x32xf32>
    %116 = vector.extract_strided_slice %112 {offsets = [0, 96], sizes = [8, 32], strides = [1, 1]} : vector<8x128xf32> to vector<8x32xf32>
    %117 = arith.mulf %114, %98 : vector<8x32xf32>
    %118 = arith.mulf %113, %115 : vector<8x32xf32>
    %119 = arith.addf %117, %118 : vector<8x32xf32>
    %120 = math.tanh %119 : vector<8x32xf32>
    %121 = arith.mulf %116, %120 : vector<8x32xf32>
    %122 = arith.truncf %121 : vector<8x32xf32> to vector<8x32xbf16>
    %c32_38 = arith.constant 32 : index
    %c0_39 = arith.constant 0 : index
    %123 = vector.load %arg9[%c32_38, %c0_39] : memref<64x32xbf16, #tpu.memory_space<vmem>>, vector<8x32xbf16>
    tpu.vector_store %arg9[%c32_38, %c0_39], %122 {strides = array<i32>} : memref<64x32xbf16, #tpu.memory_space<vmem>>, vector<8x32xbf16>,
    %c40 = arith.constant 40 : index
    %c0_40 = arith.constant 0 : index
    %124 = vector.load %arg8[%c40, %c0_40] : memref<64x128xf32, #tpu.memory_space<vmem>>, vector<8x128xf32>
    %cst_41 = arith.constant dense<0.000000e+00> : vector<8x128xf32>
    %125 = tpu.matmul %122, %9, %cst_41 {dimension_numbers = #tpu.dot_dimension_numbers<[1], [0], [0], [1], [0, 0, 1, 1], [], []>} : vector<8x32xbf16>, vector<32x128xbf16>, vector<8x128xf32> -> vector<8x128xf32>
    %126 = arith.addf %124, %125 : vector<8x128xf32>
    %127 = arith.negf %126 : vector<8x128xf32>
    %128 = math.exp %127 : vector<8x128xf32>
    %cst_42 = arith.constant 1.000000e+00 : f32
    %129 = vector.broadcast %cst_42 : f32 to vector<8x128xf32>
    %130 = arith.addf %129, %128 : vector<8x128xf32>
    %131 = arith.divf %129, %130 : vector<8x128xf32>
    %132 = math.tanh %126 : vector<8x128xf32>
    %133 = arith.select %5, %132, %131 : vector<8x128xi1>, vector<8x128xf32>
    %134 = vector.extract_strided_slice %133 {offsets = [0, 0], sizes = [8, 32], strides = [1, 1]} : vector<8x128xf32> to vector<8x32xf32>
    %135 = vector.extract_strided_slice %133 {offsets = [0, 32], sizes = [8, 32], strides = [1, 1]} : vector<8x128xf32> to vector<8x32xf32>
    %136 = vector.extract_strided_slice %133 {offsets = [0, 64], sizes = [8, 32], strides = [1, 1]} : vector<8x128xf32> to vector<8x32xf32>
    %137 = vector.extract_strided_slice %133 {offsets = [0, 96], sizes = [8, 32], strides = [1, 1]} : vector<8x128xf32> to vector<8x32xf32>
    %138 = arith.mulf %135, %119 : vector<8x32xf32>
    %139 = arith.mulf %134, %136 : vector<8x32xf32>
    %140 = arith.addf %138, %139 : vector<8x32xf32>
    %141 = math.tanh %140 : vector<8x32xf32>
    %142 = arith.mulf %137, %141 : vector<8x32xf32>
    %143 = arith.truncf %142 : vector<8x32xf32> to vector<8x32xbf16>
    %c40_43 = arith.constant 40 : index
    %c0_44 = arith.constant 0 : index
    %144 = vector.load %arg9[%c40_43, %c0_44] : memref<64x32xbf16, #tpu.memory_space<vmem>>, vector<8x32xbf16>
    tpu.vector_store %arg9[%c40_43, %c0_44], %143 {strides = array<i32>} : memref<64x32xbf16, #tpu.memory_space<vmem>>, vector<8x32xbf16>,
    %c48 = arith.constant 48 : index
    %c0_45 = arith.constant 0 : index
    %145 = vector.load %arg8[%c48, %c0_45] : memref<64x128xf32, #tpu.memory_space<vmem>>, vector<8x128xf32>
    %cst_46 = arith.constant dense<0.000000e+00> : vector<8x128xf32>
    %146 = tpu.matmul %143, %9, %cst_46 {dimension_numbers = #tpu.dot_dimension_numbers<[1], [0], [0], [1], [0, 0, 1, 1], [], []>} : vector<8x32xbf16>, vector<32x128xbf16>, vector<8x128xf32> -> vector<8x128xf32>
    %147 = arith.addf %145, %146 : vector<8x128xf32>
    %148 = arith.negf %147 : vector<8x128xf32>
    %149 = math.exp %148 : vector<8x128xf32>
    %cst_47 = arith.constant 1.000000e+00 : f32
    %150 = vector.broadcast %cst_47 : f32 to vector<8x128xf32>
    %151 = arith.addf %150, %149 : vector<8x128xf32>
    %152 = arith.divf %150, %151 : vector<8x128xf32>
    %153 = math.tanh %147 : vector<8x128xf32>
    %154 = arith.select %5, %153, %152 : vector<8x128xi1>, vector<8x128xf32>
    %155 = vector.extract_strided_slice %154 {offsets = [0, 0], sizes = [8, 32], strides = [1, 1]} : vector<8x128xf32> to vector<8x32xf32>
    %156 = vector.extract_strided_slice %154 {offsets = [0, 32], sizes = [8, 32], strides = [1, 1]} : vector<8x128xf32> to vector<8x32xf32>
    %157 = vector.extract_strided_slice %154 {offsets = [0, 64], sizes = [8, 32], strides = [1, 1]} : vector<8x128xf32> to vector<8x32xf32>
    %158 = vector.extract_strided_slice %154 {offsets = [0, 96], sizes = [8, 32], strides = [1, 1]} : vector<8x128xf32> to vector<8x32xf32>
    %159 = arith.mulf %156, %140 : vector<8x32xf32>
    %160 = arith.mulf %155, %157 : vector<8x32xf32>
    %161 = arith.addf %159, %160 : vector<8x32xf32>
    %162 = math.tanh %161 : vector<8x32xf32>
    %163 = arith.mulf %158, %162 : vector<8x32xf32>
    %164 = arith.truncf %163 : vector<8x32xf32> to vector<8x32xbf16>
    %c48_48 = arith.constant 48 : index
    %c0_49 = arith.constant 0 : index
    %165 = vector.load %arg9[%c48_48, %c0_49] : memref<64x32xbf16, #tpu.memory_space<vmem>>, vector<8x32xbf16>
    tpu.vector_store %arg9[%c48_48, %c0_49], %164 {strides = array<i32>} : memref<64x32xbf16, #tpu.memory_space<vmem>>, vector<8x32xbf16>,
    %c56 = arith.constant 56 : index
    %c0_50 = arith.constant 0 : index
    %166 = vector.load %arg8[%c56, %c0_50] : memref<64x128xf32, #tpu.memory_space<vmem>>, vector<8x128xf32>
    %cst_51 = arith.constant dense<0.000000e+00> : vector<8x128xf32>
    %167 = tpu.matmul %164, %9, %cst_51 {dimension_numbers = #tpu.dot_dimension_numbers<[1], [0], [0], [1], [0, 0, 1, 1], [], []>} : vector<8x32xbf16>, vector<32x128xbf16>, vector<8x128xf32> -> vector<8x128xf32>
    %168 = arith.addf %166, %167 : vector<8x128xf32>
    %169 = arith.negf %168 : vector<8x128xf32>
    %170 = math.exp %169 : vector<8x128xf32>
    %cst_52 = arith.constant 1.000000e+00 : f32
    %171 = vector.broadcast %cst_52 : f32 to vector<8x128xf32>
    %172 = arith.addf %171, %170 : vector<8x128xf32>
    %173 = arith.divf %171, %172 : vector<8x128xf32>
    %174 = math.tanh %168 : vector<8x128xf32>
    %175 = arith.select %5, %174, %173 : vector<8x128xi1>, vector<8x128xf32>
    %176 = vector.extract_strided_slice %175 {offsets = [0, 0], sizes = [8, 32], strides = [1, 1]} : vector<8x128xf32> to vector<8x32xf32>
    %177 = vector.extract_strided_slice %175 {offsets = [0, 32], sizes = [8, 32], strides = [1, 1]} : vector<8x128xf32> to vector<8x32xf32>
    %178 = vector.extract_strided_slice %175 {offsets = [0, 64], sizes = [8, 32], strides = [1, 1]} : vector<8x128xf32> to vector<8x32xf32>
    %179 = vector.extract_strided_slice %175 {offsets = [0, 96], sizes = [8, 32], strides = [1, 1]} : vector<8x128xf32> to vector<8x32xf32>
    %180 = arith.mulf %177, %161 : vector<8x32xf32>
    %181 = arith.mulf %176, %178 : vector<8x32xf32>
    %182 = arith.addf %180, %181 : vector<8x32xf32>
    %183 = math.tanh %182 : vector<8x32xf32>
    %184 = arith.mulf %179, %183 : vector<8x32xf32>
    %185 = arith.truncf %184 : vector<8x32xf32> to vector<8x32xbf16>
    %c56_53 = arith.constant 56 : index
    %c0_54 = arith.constant 0 : index
    %186 = vector.load %arg9[%c56_53, %c0_54] : memref<64x32xbf16, #tpu.memory_space<vmem>>, vector<8x32xbf16>
    tpu.vector_store %arg9[%c56_53, %c0_54], %185 {strides = array<i32>} : memref<64x32xbf16, #tpu.memory_space<vmem>>, vector<8x32xbf16>,
    %c0_55 = arith.constant 0 : index
    %c0_56 = arith.constant 0 : index
    %c0_57 = arith.constant 0 : index
    %187 = vector.load %arg7[%c0_55, %c0_56, %c0_57] : memref<2x8x32xf32, #tpu.memory_space<vmem>>, vector<1x8x32xf32>
    %188 = vector.shape_cast %187 : vector<1x8x32xf32> to vector<8x32xf32>
    %189 = vector.shape_cast %184 : vector<8x32xf32> to vector<1x8x32xf32>
    tpu.vector_store %arg7[%c0_55, %c0_56, %c0_57], %189 {strides = array<i32>} : memref<2x8x32xf32, #tpu.memory_space<vmem>>, vector<1x8x32xf32>,
    %c1 = arith.constant 1 : index
    %c0_58 = arith.constant 0 : index
    %c0_59 = arith.constant 0 : index
    %190 = vector.load %arg1[%c1, %c0_58, %c0_59] : memref<2x32x128xbf16, #tpu.memory_space<vmem>>, vector<1x32x128xbf16>
    %191 = vector.shape_cast %190 : vector<1x32x128xbf16> to vector<32x128xbf16>
    %c1_60 = arith.constant 1 : index
    %c0_61 = arith.constant 0 : index
    %c0_62 = arith.constant 0 : index
    %192 = vector.load %arg2[%c1_60, %c0_61, %c0_62] : memref<2x32x128xbf16, #tpu.memory_space<vmem>>, vector<1x32x128xbf16>
    %193 = vector.shape_cast %192 : vector<1x32x128xbf16> to vector<32x128xbf16>
    %c1_63 = arith.constant 1 : index
    %c0_64 = arith.constant 0 : index
    %c0_65 = arith.constant 0 : index
    %194 = vector.load %arg3[%c1_63, %c0_64, %c0_65] : memref<2x1x128xf32, #tpu.memory_space<vmem>>, vector<1x1x128xf32>
    %195 = vector.shape_cast %194 : vector<1x1x128xf32> to vector<1x128xf32>
    %c0_66 = arith.constant 0 : index
    %c0_67 = arith.constant 0 : index
    %196 = vector.load %arg9[%c0_66, %c0_67] : memref<64x32xbf16, #tpu.memory_space<vmem>>, vector<64x32xbf16>
    %cst_68 = arith.constant dense<0.000000e+00> : vector<64x128xf32>
    %197 = tpu.matmul %196, %191, %cst_68 {dimension_numbers = #tpu.dot_dimension_numbers<[1], [0], [0], [1], [0, 0, 1, 1], [], []>} : vector<64x32xbf16>, vector<32x128xbf16>, vector<64x128xf32> -> vector<64x128xf32>
    %198 = vector.broadcast %195 : vector<1x128xf32> to vector<64x128xf32>
    %199 = arith.addf %197, %198 : vector<64x128xf32>
    %c0_69 = arith.constant 0 : index
    %c0_70 = arith.constant 0 : index
    %200 = vector.load %arg8[%c0_69, %c0_70] : memref<64x128xf32, #tpu.memory_space<vmem>>, vector<64x128xf32>
    tpu.vector_store %arg8[%c0_69, %c0_70], %199 {strides = array<i32>} : memref<64x128xf32, #tpu.memory_space<vmem>>, vector<64x128xf32>,
    %cst_71 = arith.constant 0.000000e+00 : bf16
    %201 = vector.broadcast %cst_71 : bf16 to vector<8x32xbf16>
    %cst_72 = arith.constant 0.000000e+00 : f32
    %202 = vector.broadcast %cst_72 : f32 to vector<8x32xf32>
    %c0_73 = arith.constant 0 : index
    %c0_74 = arith.constant 0 : index
    %203 = vector.load %arg8[%c0_73, %c0_74] : memref<64x128xf32, #tpu.memory_space<vmem>>, vector<8x128xf32>
    %cst_75 = arith.constant dense<0.000000e+00> : vector<8x128xf32>
    %204 = tpu.matmul %201, %193, %cst_75 {dimension_numbers = #tpu.dot_dimension_numbers<[1], [0], [0], [1], [0, 0, 1, 1], [], []>} : vector<8x32xbf16>, vector<32x128xbf16>, vector<8x128xf32> -> vector<8x128xf32>
    %205 = arith.addf %203, %204 : vector<8x128xf32>
    %206 = arith.negf %205 : vector<8x128xf32>
    %207 = math.exp %206 : vector<8x128xf32>
    %cst_76 = arith.constant 1.000000e+00 : f32
    %208 = vector.broadcast %cst_76 : f32 to vector<8x128xf32>
    %209 = arith.addf %208, %207 : vector<8x128xf32>
    %210 = arith.divf %208, %209 : vector<8x128xf32>
    %211 = math.tanh %205 : vector<8x128xf32>
    %212 = arith.select %5, %211, %210 : vector<8x128xi1>, vector<8x128xf32>
    %213 = vector.extract_strided_slice %212 {offsets = [0, 0], sizes = [8, 32], strides = [1, 1]} : vector<8x128xf32> to vector<8x32xf32>
    %214 = vector.extract_strided_slice %212 {offsets = [0, 32], sizes = [8, 32], strides = [1, 1]} : vector<8x128xf32> to vector<8x32xf32>
    %215 = vector.extract_strided_slice %212 {offsets = [0, 64], sizes = [8, 32], strides = [1, 1]} : vector<8x128xf32> to vector<8x32xf32>
    %216 = vector.extract_strided_slice %212 {offsets = [0, 96], sizes = [8, 32], strides = [1, 1]} : vector<8x128xf32> to vector<8x32xf32>
    %217 = arith.mulf %214, %202 : vector<8x32xf32>
    %218 = arith.mulf %213, %215 : vector<8x32xf32>
    %219 = arith.addf %217, %218 : vector<8x32xf32>
    %220 = math.tanh %219 : vector<8x32xf32>
    %221 = arith.mulf %216, %220 : vector<8x32xf32>
    %222 = arith.truncf %221 : vector<8x32xf32> to vector<8x32xbf16>
    %c0_77 = arith.constant 0 : index
    %c0_78 = arith.constant 0 : index
    %223 = vector.load %arg9[%c0_77, %c0_78] : memref<64x32xbf16, #tpu.memory_space<vmem>>, vector<8x32xbf16>
    tpu.vector_store %arg9[%c0_77, %c0_78], %222 {strides = array<i32>} : memref<64x32xbf16, #tpu.memory_space<vmem>>, vector<8x32xbf16>,
    %c8_79 = arith.constant 8 : index
    %c0_80 = arith.constant 0 : index
    %224 = vector.load %arg8[%c8_79, %c0_80] : memref<64x128xf32, #tpu.memory_space<vmem>>, vector<8x128xf32>
    %cst_81 = arith.constant dense<0.000000e+00> : vector<8x128xf32>
    %225 = tpu.matmul %222, %193, %cst_81 {dimension_numbers = #tpu.dot_dimension_numbers<[1], [0], [0], [1], [0, 0, 1, 1], [], []>} : vector<8x32xbf16>, vector<32x128xbf16>, vector<8x128xf32> -> vector<8x128xf32>
    %226 = arith.addf %224, %225 : vector<8x128xf32>
    %227 = arith.negf %226 : vector<8x128xf32>
    %228 = math.exp %227 : vector<8x128xf32>
    %cst_82 = arith.constant 1.000000e+00 : f32
    %229 = vector.broadcast %cst_82 : f32 to vector<8x128xf32>
    %230 = arith.addf %229, %228 : vector<8x128xf32>
    %231 = arith.divf %229, %230 : vector<8x128xf32>
    %232 = math.tanh %226 : vector<8x128xf32>
    %233 = arith.select %5, %232, %231 : vector<8x128xi1>, vector<8x128xf32>
    %234 = vector.extract_strided_slice %233 {offsets = [0, 0], sizes = [8, 32], strides = [1, 1]} : vector<8x128xf32> to vector<8x32xf32>
    %235 = vector.extract_strided_slice %233 {offsets = [0, 32], sizes = [8, 32], strides = [1, 1]} : vector<8x128xf32> to vector<8x32xf32>
    %236 = vector.extract_strided_slice %233 {offsets = [0, 64], sizes = [8, 32], strides = [1, 1]} : vector<8x128xf32> to vector<8x32xf32>
    %237 = vector.extract_strided_slice %233 {offsets = [0, 96], sizes = [8, 32], strides = [1, 1]} : vector<8x128xf32> to vector<8x32xf32>
    %238 = arith.mulf %235, %219 : vector<8x32xf32>
    %239 = arith.mulf %234, %236 : vector<8x32xf32>
    %240 = arith.addf %238, %239 : vector<8x32xf32>
    %241 = math.tanh %240 : vector<8x32xf32>
    %242 = arith.mulf %237, %241 : vector<8x32xf32>
    %243 = arith.truncf %242 : vector<8x32xf32> to vector<8x32xbf16>
    %c8_83 = arith.constant 8 : index
    %c0_84 = arith.constant 0 : index
    %244 = vector.load %arg9[%c8_83, %c0_84] : memref<64x32xbf16, #tpu.memory_space<vmem>>, vector<8x32xbf16>
    tpu.vector_store %arg9[%c8_83, %c0_84], %243 {strides = array<i32>} : memref<64x32xbf16, #tpu.memory_space<vmem>>, vector<8x32xbf16>,
    %c16_85 = arith.constant 16 : index
    %c0_86 = arith.constant 0 : index
    %245 = vector.load %arg8[%c16_85, %c0_86] : memref<64x128xf32, #tpu.memory_space<vmem>>, vector<8x128xf32>
    %cst_87 = arith.constant dense<0.000000e+00> : vector<8x128xf32>
    %246 = tpu.matmul %243, %193, %cst_87 {dimension_numbers = #tpu.dot_dimension_numbers<[1], [0], [0], [1], [0, 0, 1, 1], [], []>} : vector<8x32xbf16>, vector<32x128xbf16>, vector<8x128xf32> -> vector<8x128xf32>
    %247 = arith.addf %245, %246 : vector<8x128xf32>
    %248 = arith.negf %247 : vector<8x128xf32>
    %249 = math.exp %248 : vector<8x128xf32>
    %cst_88 = arith.constant 1.000000e+00 : f32
    %250 = vector.broadcast %cst_88 : f32 to vector<8x128xf32>
    %251 = arith.addf %250, %249 : vector<8x128xf32>
    %252 = arith.divf %250, %251 : vector<8x128xf32>
    %253 = math.tanh %247 : vector<8x128xf32>
    %254 = arith.select %5, %253, %252 : vector<8x128xi1>, vector<8x128xf32>
    %255 = vector.extract_strided_slice %254 {offsets = [0, 0], sizes = [8, 32], strides = [1, 1]} : vector<8x128xf32> to vector<8x32xf32>
    %256 = vector.extract_strided_slice %254 {offsets = [0, 32], sizes = [8, 32], strides = [1, 1]} : vector<8x128xf32> to vector<8x32xf32>
    %257 = vector.extract_strided_slice %254 {offsets = [0, 64], sizes = [8, 32], strides = [1, 1]} : vector<8x128xf32> to vector<8x32xf32>
    %258 = vector.extract_strided_slice %254 {offsets = [0, 96], sizes = [8, 32], strides = [1, 1]} : vector<8x128xf32> to vector<8x32xf32>
    %259 = arith.mulf %256, %240 : vector<8x32xf32>
    %260 = arith.mulf %255, %257 : vector<8x32xf32>
    %261 = arith.addf %259, %260 : vector<8x32xf32>
    %262 = math.tanh %261 : vector<8x32xf32>
    %263 = arith.mulf %258, %262 : vector<8x32xf32>
    %264 = arith.truncf %263 : vector<8x32xf32> to vector<8x32xbf16>
    %c16_89 = arith.constant 16 : index
    %c0_90 = arith.constant 0 : index
    %265 = vector.load %arg9[%c16_89, %c0_90] : memref<64x32xbf16, #tpu.memory_space<vmem>>, vector<8x32xbf16>
    tpu.vector_store %arg9[%c16_89, %c0_90], %264 {strides = array<i32>} : memref<64x32xbf16, #tpu.memory_space<vmem>>, vector<8x32xbf16>,
    %c24_91 = arith.constant 24 : index
    %c0_92 = arith.constant 0 : index
    %266 = vector.load %arg8[%c24_91, %c0_92] : memref<64x128xf32, #tpu.memory_space<vmem>>, vector<8x128xf32>
    %cst_93 = arith.constant dense<0.000000e+00> : vector<8x128xf32>
    %267 = tpu.matmul %264, %193, %cst_93 {dimension_numbers = #tpu.dot_dimension_numbers<[1], [0], [0], [1], [0, 0, 1, 1], [], []>} : vector<8x32xbf16>, vector<32x128xbf16>, vector<8x128xf32> -> vector<8x128xf32>
    %268 = arith.addf %266, %267 : vector<8x128xf32>
    %269 = arith.negf %268 : vector<8x128xf32>
    %270 = math.exp %269 : vector<8x128xf32>
    %cst_94 = arith.constant 1.000000e+00 : f32
    %271 = vector.broadcast %cst_94 : f32 to vector<8x128xf32>
    %272 = arith.addf %271, %270 : vector<8x128xf32>
    %273 = arith.divf %271, %272 : vector<8x128xf32>
    %274 = math.tanh %268 : vector<8x128xf32>
    %275 = arith.select %5, %274, %273 : vector<8x128xi1>, vector<8x128xf32>
    %276 = vector.extract_strided_slice %275 {offsets = [0, 0], sizes = [8, 32], strides = [1, 1]} : vector<8x128xf32> to vector<8x32xf32>
    %277 = vector.extract_strided_slice %275 {offsets = [0, 32], sizes = [8, 32], strides = [1, 1]} : vector<8x128xf32> to vector<8x32xf32>
    %278 = vector.extract_strided_slice %275 {offsets = [0, 64], sizes = [8, 32], strides = [1, 1]} : vector<8x128xf32> to vector<8x32xf32>
    %279 = vector.extract_strided_slice %275 {offsets = [0, 96], sizes = [8, 32], strides = [1, 1]} : vector<8x128xf32> to vector<8x32xf32>
    %280 = arith.mulf %277, %261 : vector<8x32xf32>
    %281 = arith.mulf %276, %278 : vector<8x32xf32>
    %282 = arith.addf %280, %281 : vector<8x32xf32>
    %283 = math.tanh %282 : vector<8x32xf32>
    %284 = arith.mulf %279, %283 : vector<8x32xf32>
    %285 = arith.truncf %284 : vector<8x32xf32> to vector<8x32xbf16>
    %c24_95 = arith.constant 24 : index
    %c0_96 = arith.constant 0 : index
    %286 = vector.load %arg9[%c24_95, %c0_96] : memref<64x32xbf16, #tpu.memory_space<vmem>>, vector<8x32xbf16>
    tpu.vector_store %arg9[%c24_95, %c0_96], %285 {strides = array<i32>} : memref<64x32xbf16, #tpu.memory_space<vmem>>, vector<8x32xbf16>,
    %c32_97 = arith.constant 32 : index
    %c0_98 = arith.constant 0 : index
    %287 = vector.load %arg8[%c32_97, %c0_98] : memref<64x128xf32, #tpu.memory_space<vmem>>, vector<8x128xf32>
    %cst_99 = arith.constant dense<0.000000e+00> : vector<8x128xf32>
    %288 = tpu.matmul %285, %193, %cst_99 {dimension_numbers = #tpu.dot_dimension_numbers<[1], [0], [0], [1], [0, 0, 1, 1], [], []>} : vector<8x32xbf16>, vector<32x128xbf16>, vector<8x128xf32> -> vector<8x128xf32>
    %289 = arith.addf %287, %288 : vector<8x128xf32>
    %290 = arith.negf %289 : vector<8x128xf32>
    %291 = math.exp %290 : vector<8x128xf32>
    %cst_100 = arith.constant 1.000000e+00 : f32
    %292 = vector.broadcast %cst_100 : f32 to vector<8x128xf32>
    %293 = arith.addf %292, %291 : vector<8x128xf32>
    %294 = arith.divf %292, %293 : vector<8x128xf32>
    %295 = math.tanh %289 : vector<8x128xf32>
    %296 = arith.select %5, %295, %294 : vector<8x128xi1>, vector<8x128xf32>
    %297 = vector.extract_strided_slice %296 {offsets = [0, 0], sizes = [8, 32], strides = [1, 1]} : vector<8x128xf32> to vector<8x32xf32>
    %298 = vector.extract_strided_slice %296 {offsets = [0, 32], sizes = [8, 32], strides = [1, 1]} : vector<8x128xf32> to vector<8x32xf32>
    %299 = vector.extract_strided_slice %296 {offsets = [0, 64], sizes = [8, 32], strides = [1, 1]} : vector<8x128xf32> to vector<8x32xf32>
    %300 = vector.extract_strided_slice %296 {offsets = [0, 96], sizes = [8, 32], strides = [1, 1]} : vector<8x128xf32> to vector<8x32xf32>
    %301 = arith.mulf %298, %282 : vector<8x32xf32>
    %302 = arith.mulf %297, %299 : vector<8x32xf32>
    %303 = arith.addf %301, %302 : vector<8x32xf32>
    %304 = math.tanh %303 : vector<8x32xf32>
    %305 = arith.mulf %300, %304 : vector<8x32xf32>
    %306 = arith.truncf %305 : vector<8x32xf32> to vector<8x32xbf16>
    %c32_101 = arith.constant 32 : index
    %c0_102 = arith.constant 0 : index
    %307 = vector.load %arg9[%c32_101, %c0_102] : memref<64x32xbf16, #tpu.memory_space<vmem>>, vector<8x32xbf16>
    tpu.vector_store %arg9[%c32_101, %c0_102], %306 {strides = array<i32>} : memref<64x32xbf16, #tpu.memory_space<vmem>>, vector<8x32xbf16>,
    %c40_103 = arith.constant 40 : index
    %c0_104 = arith.constant 0 : index
    %308 = vector.load %arg8[%c40_103, %c0_104] : memref<64x128xf32, #tpu.memory_space<vmem>>, vector<8x128xf32>
    %cst_105 = arith.constant dense<0.000000e+00> : vector<8x128xf32>
    %309 = tpu.matmul %306, %193, %cst_105 {dimension_numbers = #tpu.dot_dimension_numbers<[1], [0], [0], [1], [0, 0, 1, 1], [], []>} : vector<8x32xbf16>, vector<32x128xbf16>, vector<8x128xf32> -> vector<8x128xf32>
    %310 = arith.addf %308, %309 : vector<8x128xf32>
    %311 = arith.negf %310 : vector<8x128xf32>
    %312 = math.exp %311 : vector<8x128xf32>
    %cst_106 = arith.constant 1.000000e+00 : f32
    %313 = vector.broadcast %cst_106 : f32 to vector<8x128xf32>
    %314 = arith.addf %313, %312 : vector<8x128xf32>
    %315 = arith.divf %313, %314 : vector<8x128xf32>
    %316 = math.tanh %310 : vector<8x128xf32>
    %317 = arith.select %5, %316, %315 : vector<8x128xi1>, vector<8x128xf32>
    %318 = vector.extract_strided_slice %317 {offsets = [0, 0], sizes = [8, 32], strides = [1, 1]} : vector<8x128xf32> to vector<8x32xf32>
    %319 = vector.extract_strided_slice %317 {offsets = [0, 32], sizes = [8, 32], strides = [1, 1]} : vector<8x128xf32> to vector<8x32xf32>
    %320 = vector.extract_strided_slice %317 {offsets = [0, 64], sizes = [8, 32], strides = [1, 1]} : vector<8x128xf32> to vector<8x32xf32>
    %321 = vector.extract_strided_slice %317 {offsets = [0, 96], sizes = [8, 32], strides = [1, 1]} : vector<8x128xf32> to vector<8x32xf32>
    %322 = arith.mulf %319, %303 : vector<8x32xf32>
    %323 = arith.mulf %318, %320 : vector<8x32xf32>
    %324 = arith.addf %322, %323 : vector<8x32xf32>
    %325 = math.tanh %324 : vector<8x32xf32>
    %326 = arith.mulf %321, %325 : vector<8x32xf32>
    %327 = arith.truncf %326 : vector<8x32xf32> to vector<8x32xbf16>
    %c40_107 = arith.constant 40 : index
    %c0_108 = arith.constant 0 : index
    %328 = vector.load %arg9[%c40_107, %c0_108] : memref<64x32xbf16, #tpu.memory_space<vmem>>, vector<8x32xbf16>
    tpu.vector_store %arg9[%c40_107, %c0_108], %327 {strides = array<i32>} : memref<64x32xbf16, #tpu.memory_space<vmem>>, vector<8x32xbf16>,
    %c48_109 = arith.constant 48 : index
    %c0_110 = arith.constant 0 : index
    %329 = vector.load %arg8[%c48_109, %c0_110] : memref<64x128xf32, #tpu.memory_space<vmem>>, vector<8x128xf32>
    %cst_111 = arith.constant dense<0.000000e+00> : vector<8x128xf32>
    %330 = tpu.matmul %327, %193, %cst_111 {dimension_numbers = #tpu.dot_dimension_numbers<[1], [0], [0], [1], [0, 0, 1, 1], [], []>} : vector<8x32xbf16>, vector<32x128xbf16>, vector<8x128xf32> -> vector<8x128xf32>
    %331 = arith.addf %329, %330 : vector<8x128xf32>
    %332 = arith.negf %331 : vector<8x128xf32>
    %333 = math.exp %332 : vector<8x128xf32>
    %cst_112 = arith.constant 1.000000e+00 : f32
    %334 = vector.broadcast %cst_112 : f32 to vector<8x128xf32>
    %335 = arith.addf %334, %333 : vector<8x128xf32>
    %336 = arith.divf %334, %335 : vector<8x128xf32>
    %337 = math.tanh %331 : vector<8x128xf32>
    %338 = arith.select %5, %337, %336 : vector<8x128xi1>, vector<8x128xf32>
    %339 = vector.extract_strided_slice %338 {offsets = [0, 0], sizes = [8, 32], strides = [1, 1]} : vector<8x128xf32> to vector<8x32xf32>
    %340 = vector.extract_strided_slice %338 {offsets = [0, 32], sizes = [8, 32], strides = [1, 1]} : vector<8x128xf32> to vector<8x32xf32>
    %341 = vector.extract_strided_slice %338 {offsets = [0, 64], sizes = [8, 32], strides = [1, 1]} : vector<8x128xf32> to vector<8x32xf32>
    %342 = vector.extract_strided_slice %338 {offsets = [0, 96], sizes = [8, 32], strides = [1, 1]} : vector<8x128xf32> to vector<8x32xf32>
    %343 = arith.mulf %340, %324 : vector<8x32xf32>
    %344 = arith.mulf %339, %341 : vector<8x32xf32>
    %345 = arith.addf %343, %344 : vector<8x32xf32>
    %346 = math.tanh %345 : vector<8x32xf32>
    %347 = arith.mulf %342, %346 : vector<8x32xf32>
    %348 = arith.truncf %347 : vector<8x32xf32> to vector<8x32xbf16>
    %c48_113 = arith.constant 48 : index
    %c0_114 = arith.constant 0 : index
    %349 = vector.load %arg9[%c48_113, %c0_114] : memref<64x32xbf16, #tpu.memory_space<vmem>>, vector<8x32xbf16>
    tpu.vector_store %arg9[%c48_113, %c0_114], %348 {strides = array<i32>} : memref<64x32xbf16, #tpu.memory_space<vmem>>, vector<8x32xbf16>,
    %c56_115 = arith.constant 56 : index
    %c0_116 = arith.constant 0 : index
    %350 = vector.load %arg8[%c56_115, %c0_116] : memref<64x128xf32, #tpu.memory_space<vmem>>, vector<8x128xf32>
    %cst_117 = arith.constant dense<0.000000e+00> : vector<8x128xf32>
    %351 = tpu.matmul %348, %193, %cst_117 {dimension_numbers = #tpu.dot_dimension_numbers<[1], [0], [0], [1], [0, 0, 1, 1], [], []>} : vector<8x32xbf16>, vector<32x128xbf16>, vector<8x128xf32> -> vector<8x128xf32>
    %352 = arith.addf %350, %351 : vector<8x128xf32>
    %353 = arith.negf %352 : vector<8x128xf32>
    %354 = math.exp %353 : vector<8x128xf32>
    %cst_118 = arith.constant 1.000000e+00 : f32
    %355 = vector.broadcast %cst_118 : f32 to vector<8x128xf32>
    %356 = arith.addf %355, %354 : vector<8x128xf32>
    %357 = arith.divf %355, %356 : vector<8x128xf32>
    %358 = math.tanh %352 : vector<8x128xf32>
    %359 = arith.select %5, %358, %357 : vector<8x128xi1>, vector<8x128xf32>
    %360 = vector.extract_strided_slice %359 {offsets = [0, 0], sizes = [8, 32], strides = [1, 1]} : vector<8x128xf32> to vector<8x32xf32>
    %361 = vector.extract_strided_slice %359 {offsets = [0, 32], sizes = [8, 32], strides = [1, 1]} : vector<8x128xf32> to vector<8x32xf32>
    %362 = vector.extract_strided_slice %359 {offsets = [0, 64], sizes = [8, 32], strides = [1, 1]} : vector<8x128xf32> to vector<8x32xf32>
    %363 = vector.extract_strided_slice %359 {offsets = [0, 96], sizes = [8, 32], strides = [1, 1]} : vector<8x128xf32> to vector<8x32xf32>
    %364 = arith.mulf %361, %345 : vector<8x32xf32>
    %365 = arith.mulf %360, %362 : vector<8x32xf32>
    %366 = arith.addf %364, %365 : vector<8x32xf32>
    %367 = math.tanh %366 : vector<8x32xf32>
    %368 = arith.mulf %363, %367 : vector<8x32xf32>
    %369 = arith.truncf %368 : vector<8x32xf32> to vector<8x32xbf16>
    %c56_119 = arith.constant 56 : index
    %c0_120 = arith.constant 0 : index
    %370 = vector.load %arg9[%c56_119, %c0_120] : memref<64x32xbf16, #tpu.memory_space<vmem>>, vector<8x32xbf16>
    tpu.vector_store %arg9[%c56_119, %c0_120], %369 {strides = array<i32>} : memref<64x32xbf16, #tpu.memory_space<vmem>>, vector<8x32xbf16>,
    %c1_121 = arith.constant 1 : index
    %c0_122 = arith.constant 0 : index
    %c0_123 = arith.constant 0 : index
    %371 = vector.load %arg7[%c1_121, %c0_122, %c0_123] : memref<2x8x32xf32, #tpu.memory_space<vmem>>, vector<1x8x32xf32>
    %372 = vector.shape_cast %371 : vector<1x8x32xf32> to vector<8x32xf32>
    %373 = vector.shape_cast %368 : vector<8x32xf32> to vector<1x8x32xf32>
    tpu.vector_store %arg7[%c1_121, %c0_122, %c0_123], %373 {strides = array<i32>} : memref<2x8x32xf32, #tpu.memory_space<vmem>>, vector<1x8x32xf32>,
    %c0_124 = arith.constant 0 : index
    %c0_125 = arith.constant 0 : index
    %374 = vector.load %arg9[%c0_124, %c0_125] : memref<64x32xbf16, #tpu.memory_space<vmem>>, vector<64x32xbf16>
    %c0_126 = arith.constant 0 : index
    %c0_127 = arith.constant 0 : index
    %375 = vector.load %arg4[%c0_126, %c0_127] : memref<32x128xbf16, #tpu.memory_space<vmem>>, vector<32x128xbf16>
    %cst_128 = arith.constant dense<0.000000e+00> : vector<64x128xf32>
    %376 = tpu.matmul %374, %375, %cst_128 {dimension_numbers = #tpu.dot_dimension_numbers<[1], [0], [0], [1], [0, 0, 1, 1], [], []>} : vector<64x32xbf16>, vector<32x128xbf16>, vector<64x128xf32> -> vector<64x128xf32>
    %c0_129 = arith.constant 0 : index
    %c0_130 = arith.constant 0 : index
    %377 = vector.load %arg5[%c0_129, %c0_130] : memref<1x128xf32, #tpu.memory_space<vmem>>, vector<1x128xf32>
    %378 = vector.broadcast %377 : vector<1x128xf32> to vector<64x128xf32>
    %379 = arith.addf %376, %378 : vector<64x128xf32>
    %c0_131 = arith.constant 0 : index
    %c0_132 = arith.constant 0 : index
    %380 = vector.load %arg6[%c0_131, %c0_132] : memref<64x128xf32, #tpu.memory_space<vmem>>, vector<64x128xf32>
    tpu.vector_store %arg6[%c0_131, %c0_132], %379 {strides = array<i32>} : memref<64x128xf32, #tpu.memory_space<vmem>>, vector<64x128xf32>,
    return
  }
}

</mosaic_0001>

<bundles_post_ra>
// kernel: decoder_forward.1
= control target key start
LH: loop header
LB: loop body
LE: loop exit
PB: predicated region body
PF: predicated region fallthrough
CT: control target
= control target key end

     0   :  { %vm86_vm0 = vcmask 261120   ;;  %v2131_v7 = vmov 0.0   ;;  %vm2132_vm1 = vmmov 0   ;;  %v2133_v9 = vmov 0   ;;  %s2134_s18 = smov 64   ;;  %s2135_s19 = smov 32   ;;  %s2593_s1 = inlined_call_operand.vmem [shape: bf16[2,32,128], index: 1, kind: input, shape index: {}]   ;;  %s2594_s0 = inlined_call_operand.vmem [shape: bf16[64,32], index: 0, kind: input, shape index: {}]   ;;  %s2595_s2 = inlined_call_operand.vmem [shape: bf16[2,32,128], index: 2, kind: input, shape index: {}]   ;;  %s2596_s3 = inlined_call_operand.vmem [shape: f32[2,1,128], index: 3, kind: input, shape index: {}]   ;;  %s2597_s4 = inlined_call_operand.vmem [shape: bf16[32,128], index: 4, kind: input, shape index: {}]   ;;  %s2598_s7 = inlined_call_operand.vmem [shape: f32[2,8,32], index: 7, kind: output, shape index: {1}]   ;;  %s2599_s5 = inlined_call_operand.vmem [shape: f32[1,128], index: 5, kind: input, shape index: {}]   ;;  %s2600_s6 = inlined_call_operand.vmem [shape: f32[64,128], index: 6, kind: output, shape index: {0}]  }
   0x1   :  { %v1989_v0 = vld [vmem:[%s2593_s1] sm:$0xff]   ;;  %v1990_v1 = vld [vmem:[%s2593_s1 + $0x8] sm:$0xff]   ;;  %v1991_v2 = vld [vmem:[%s2594_s0 + $0x10] sm:$0xff]   ;;  %v26_v34 = vlaneseq  ;;  %vm259_vm5 = vcmask 257024   ;;  %vm337_vm6 = vcmask 261124  }
   0x2   :  { %1980 = vmatprep.subr.bf16.mxu1 %v1989_v0  ;;  %1816 = vmatprep.subr.bf16.mxu0 %v1989_v0  ;;  %v1992_v3 = vld [vmem:[%s2594_s0 + $0x18] sm:$0xff]   ;;  %v1994_v4 = vld [vmem:[%s2594_s0] sm:$0xff]   ;;  %v1995_v5 = vld [vmem:[%s2594_s0 + $0x8] sm:$0xff]  }
   0x3   :  { %1982 = vmatpush3.bf16.msra.mxu1 %v1989_v0  ;;  %1817 = vmatpush3.bf16.msra.mxu0 %v1989_v0  ;;  %v2198_v6 = vld [vmem:[%s2595_s2] sm:$0xff]   ;;  %v2209_v8 = vld [vmem:[%s2595_s2 + $0x8] sm:$0xff]   ;;  %v27_v36 = vand.u32 127, %v26_v34 }
   0x4   :  { %1981 = vmatprep.subr.bf16.mxu1 %v1990_v1  ;;  %1818 = vmatprep.subr.bf16.mxu0 %v1990_v1  ;;  %v1681_v10 = vld [vmem:[%s2596_s3] ss:$0 sm:$0xff] }
   0x5   :  { %1824 = vmatprep.mubr.msk.bf16.mxu1 %vm86_vm0, %v1991_v2  ;;  %1820 = vmatprep.mubr.msk.bf16.mxu0 %vm86_vm0, %v1994_v4  ;;  %vm28_vm2 = vcmp.ge.s32.totalorder %v27_v36, 64  ;;  %vm29_vm3 = vcmp.lt.s32.totalorder %v27_v36, 96 }
   0x6   :  { %vm2244_vm4 = vmand %vm28_vm2, %vm29_vm3 }
   0x7   :  { %1983 = vmatpush3.bf16.msra.mxu1 %v1990_v1  ;;  %1819 = vmatpush3.bf16.msra.mxu0 %v1990_v1 }
   0x8   :  { %1828 = vmatprep.subr.bf16.mxu1 %v2131_v7  ;;  %1844 = vmatprep.subr.bf16.mxu0 %v2131_v7 }
   0xa   :  { %1825 = vmatmul.mubr.msk.bf16.vlgmr.msra.gmra.mrb[0].mxu1 %vm86_vm0, %v1992_v3  ;;  %1821 = vmatmul.mubr.msk.bf16.vlgmr.msra.gmra.mrb[0].mxu0 %vm86_vm0, %v1995_v5 }
   0xb   :  { %1829 = vmatpush3.bf16.msra.mxu1 %v2198_v6  ;;  %1832 = vmatprep.mubr.msk.bf16.mxu1 %vm2132_vm1, %v2131_v7 }
   0xc   :  { %1830 = vmatprep.subr.bf16.mxu1 %v2131_v7  ;;  %1845 = vmatpush3.bf16.msra.mxu0 %v2198_v6 }
   0xd   :  { %1846 = vmatprep.subr.bf16.mxu0 %v2131_v7  ;;  %1848 = vmatprep.mubr.msk.bf16.mxu0 %vm2132_vm1, %v2131_v7 }
   0xf   :  { %1831 = vmatpush3.bf16.msra.mxu1 %v2209_v8 }
  0x10   :  { %1836 = vmatprep.subr.bf16.mxu1 %v2131_v7  ;;  %1847 = vmatpush3.bf16.msra.mxu0 %v2209_v8 }
  0x11   :  { %1860 = vmatprep.subr.bf16.mxu0 %v2131_v7 }
  0x12   :  { %1833 = vmatmul.mubr.bf16.vlgmr.msra.gmra.mrb[4].mxu1 %v2133_v9 }
  0x13   :  { %1837 = vmatpush3.bf16.msra.mxu1 %v2198_v6  ;;  %1840 = vmatprep.mubr.msk.bf16.mxu1 %vm2132_vm1, %v2131_v7 }
  0x14   :  { %1838 = vmatprep.subr.bf16.mxu1 %v2131_v7 }
  0x17   :  { %1839 = vmatpush3.bf16.msra.mxu1 %v2209_v8 }
  0x18   :  { %1852 = vmatprep.subr.bf16.mxu1 %v2131_v7 }
  0xdd   :  { %v1826_v11 = vpop.f32.mrb[0].mxu1  ;;  %v1822_v12 = vpop.f32.mrb[0].mxu0 }
  0xde   :  { %v2232_v13 = vadd.f32 %v1826_v11, %v1681_v10  ;;  %v149_v14 = vpop.f32.mrb[1].mxu1  ;;  %v2234_v15 = vadd.f32 %v1822_v12, %v1681_v10  ;;  %v133_v16 = vpop.f32.mrb[1].mxu0 }
  0xdf   :  { %v2236_v17 = vadd.f32 %v1681_v10, %v149_v14  ;;  %v1827_v18 = vpop.f32.mrb[2].mxu1  ;;  %v1823_v19 = vpop.f32.mrb[2].mxu0  ;;  %v134_v26 = vadd.f32 %v1681_v10, %v133_v16 }
  0xe0   :  { %v2238_v20 = vadd.f32 %v1827_v18, %v1681_v10  ;;  %v152_v21 = vpop.f32.mrb[3].mxu1  ;;  %v2240_v22 = vadd.f32 %v1823_v19, %v1681_v10  ;;  %v136_v23 = vpop.f32.mrb[3].mxu0 }
  0xe1   :  { %v2242_v24 = vadd.f32 %v1681_v10, %v152_v21  ;;  %v137_v25 = vadd.f32 %v1681_v10, %v136_v23 }
  0xe5   :  { %v222_v27 = vpop.f32.mrb[4].mxu1 }
  0xe6   :  { %v228_v28 = vadd.f32 %v222_v27, %v134_v26  ;;  %v1834_v29 = vpop.f32.mrb[5].mxu1 }
  0xe7   :  { %v225_v30 = vpop.f32.mrb[6].mxu1 }
  0xe8   :  { %v1694_v31 = vmul.f32 -1.442695, %v228_v28  ;;  %v1835_v32 = vpop.f32.mrb[7].mxu1 }
  0xea   :  { %2003 = vpow2.f32 %v1694_v31 }
  0xeb   :  { %2005 = vtanh.f32 %v228_v28 }
  0xf4   :  { %v2004_v33 = vpop.eup %2003 }
  0xf5   :  { %v232_v35 = vadd.f32 1.0, %v2004_v33  ;;  %v2006_v38 = vpop.eup %2005 }
  0xf7   :  { %2007 = vrcp.f32 %v232_v35 }
 0x101   :  { %v2008_v39 = vpop.eup %2007 }
 0x102   :  { %v236_v40 = vsel %vm2244_vm4, %v2006_v38, %v2008_v39 }
 0x103   :  { %239 = vrot.lane.b32.xlu0 %v236_v40, %s2134_s18  ;;  %v237_v43 = vmul.f32 0.0, %v236_v40 }
 0x175   :  { %v240_v41 = vpop.permute.xlu0 %239 }
 0x176   :  { %v242_v42 = vmul.f32 %v240_v41, %v236_v40 }
 0x178   :  { %244 = vrot.lane.b32.xlu0 %v242_v42, %s2135_s19 }
 0x1ea   :  { %v245_v44 = vpop.permute.xlu0 %244 }
 0x1eb   :  { %v247_v45 = vadd.f32 %v245_v44, %v237_v43 }
 0x1ed   :  { %2009 = vtanh.f32 %v247_v45 }
 0x1f7   :  { %v2010_v46 = vpop.eup %2009 }
 0x1f8   :  { %250 = vrot.lane.b32.xlu1 %v2010_v46, %s2134_s18 }
 0x26a   :  { %v251_v47 = vpop.permute.xlu1 %250 }
 0x26b   :  { %v253_v48 = vmul.f32 %v251_v47, %v236_v40 }
 0x26d   :  { %v254_v49 = vpack.c.bf16 %v253_v48, %v253_v48 }
 0x26f   :  { %256 = vrot.lane.b32.xlu1 %v254_v49, %s2135_s19 }
 0x2e1   :  { %v257_v50 = vpop.permute.xlu1 %256 }
 0x2e2   :  { %260 = vst.msk [vmem:[#allocation3] sm:$0xf] %vm259_vm5, %v257_v50  ;;  %1841 = vmatmul.mubr.msk.bf16.vlgmr.msra.gmra.mrb[8].mxu1 %vm86_vm0, %v257_v50 }
 0x2e3   :  { %1853 = vmatpush3.bf16.msra.mxu1 %v2198_v6  ;;  %1856 = vmatprep.mubr.msk.bf16.mxu1 %vm2132_vm1, %v2131_v7 }
 0x2e4   :  { %1854 = vmatprep.subr.bf16.mxu1 %v2131_v7 }
 0x2e7   :  { %1855 = vmatpush3.bf16.msra.mxu1 %v2209_v8 }
 0x2e8   :  { %1868 = vmatprep.subr.bf16.mxu1 %v2131_v7 }
 0x3b5   :  { %v299_v51 = vpop.f32.mrb[8].mxu1 }
 0x3b6   :  { %v305_v52 = vadd.f32 %v299_v51, %v137_v25  ;;  %v1842_v53 = vpop.f32.mrb[9].mxu1 }
 0x3b7   :  { %v302_v54 = vpop.f32.mrb[10].mxu1 }
 0x3b8   :  { %v1696_v55 = vmul.f32 -1.442695, %v305_v52  ;;  %v1843_v56 = vpop.f32.mrb[11].mxu1 }
 0x3ba   :  { %2011 = vpow2.f32 %v1696_v55 }
 0x3bb   :  { %2013 = vtanh.f32 %v305_v52 }
 0x3c4   :  { %v2012_v57 = vpop.eup %2011 }
 0x3c5   :  { %v309_v58 = vadd.f32 1.0, %v2012_v57  ;;  %v2014_v59 = vpop.eup %2013 }
 0x3c7   :  { %2015 = vrcp.f32 %v309_v58 }
 0x3d1   :  { %v2016_v60 = vpop.eup %2015 }
 0x3d2   :  { %v313_v61 = vsel %vm2244_vm4, %v2014_v59, %v2016_v60 }
 0x3d3   :  { %316 = vrot.lane.b32.xlu0 %v313_v61, %s2134_s18  ;;  %v314_v0 = vmul.f32 %v313_v61, %v247_v45 }
 0x445   :  { %v317_v62 = vpop.permute.xlu0 %316 }
 0x446   :  { %v319_v63 = vmul.f32 %v317_v62, %v313_v61 }
 0x448   :  { %321 = vrot.lane.b32.xlu1 %v319_v63, %s2135_s19 }
 0x4ba   :  { %v322_v1 = vpop.permute.xlu1 %321 }
 0x4bb   :  { %v324_v2 = vadd.f32 %v322_v1, %v314_v0 }
 0x4bd   :  { %2017 = vtanh.f32 %v324_v2 }
 0x4c7   :  { %v2018_v3 = vpop.eup %2017 }
 0x4c8   :  { %327 = vrot.lane.b32.xlu0 %v2018_v3, %s2134_s18 }
 0x53a   :  { %v328_v4 = vpop.permute.xlu0 %327 }
 0x53b   :  { %v330_v5 = vmul.f32 %v328_v4, %v313_v61 }
 0x53d   :  { %v2267_v10 = vpack.c.bf16 %v330_v5, %v330_v5 }
 0x53f   :  { %340 = vrot.lane.b32.xlu1 %v2267_v10, %s2135_s19 }
 0x5b1   :  { %v341_v11 = vpop.permute.xlu1 %340 }
 0x5b2   :  { %1849 = vmatmul.mubr.msk.bf16.vlgmr.msra.gmra.mrb[4].mxu0 %vm86_vm0, %v341_v11 }
 0x5b3   :  { %1861 = vmatpush3.bf16.msra.mxu0 %v2198_v6  ;;  %1864 = vmatprep.mubr.msk.bf16.mxu0 %vm2132_vm1, %v2131_v7 }
 0x5b4   :  { %1862 = vmatprep.subr.bf16.mxu0 %v2131_v7 }
 0x5b7   :  { %1863 = vmatpush3.bf16.msra.mxu0 %v2209_v8 }
 0x5b8   :  { %1876 = vmatprep.subr.bf16.mxu0 %v2131_v7 }
 0x685   :  { %v379_v12 = vpop.f32.mrb[4].mxu0 }
 0x686   :  { %v385_v14 = vadd.f32 %v379_v12, %v2234_v15  ;;  %v1850_v16 = vpop.f32.mrb[5].mxu0 }
 0x687   :  { %v382_v18 = vpop.f32.mrb[6].mxu0 }
 0x688   :  { %v1698_v19 = vmul.f32 -1.442695, %v385_v14  ;;  %v1851_v21 = vpop.f32.mrb[7].mxu0 }
 0x68a   :  { %2019 = vpow2.f32 %v1698_v19 }
 0x68b   :  { %2021 = vtanh.f32 %v385_v14 }
 0x694   :  { %v2020_v23 = vpop.eup %2019 }
 0x695   :  { %v389_v25 = vadd.f32 1.0, %v2020_v23  ;;  %v2022_v26 = vpop.eup %2021 }
 0x697   :  { %2023 = vrcp.f32 %v389_v25 }
 0x6a1   :  { %v2024_v27 = vpop.eup %2023 }
 0x6a2   :  { %v393_v28 = vsel %vm2244_vm4, %v2022_v26, %v2024_v27 }
 0x6a3   :  { %396 = vrot.lane.b32.xlu0 %v393_v28, %s2134_s18  ;;  %v394_v15 = vmul.f32 %v393_v28, %v324_v2 }
 0x715   :  { %v397_v29 = vpop.permute.xlu0 %396 }
 0x716   :  { %v399_v30 = vmul.f32 %v397_v29, %v393_v28 }
 0x718   :  { %401 = vrot.lane.b32.xlu1 %v399_v30, %s2135_s19 }
 0x78a   :  { %v402_v31 = vpop.permute.xlu1 %401 }
 0x78b   :  { %v404_v32 = vadd.f32 %v402_v31, %v394_v15 }
 0x78d   :  { %2025 = vtanh.f32 %v404_v32 }
 0x797   :  { %v2026_v33 = vpop.eup %2025 }
 0x798   :  { %407 = vrot.lane.b32.xlu0 %v2026_v33, %s2134_s18 }
 0x80a   :  { %v408_v34 = vpop.permute.xlu0 %407 }
 0x80b   :  { %v410_v35 = vmul.f32 %v408_v34, %v393_v28 }
 0x80d   :  { %v411_v36 = vpack.c.bf16 %v410_v35, %v410_v35 }
 0x80f   :  { %413 = vrot.lane.b32.xlu1 %v411_v36, %s2135_s19 }
 0x881   :  { %v414_v38 = vpop.permute.xlu1 %413 }
 0x882   :  { %416 = vst.msk [vmem:[#allocation3 + $0x8] sm:$0xf] %vm259_vm5, %v414_v38  ;;  %1857 = vmatmul.mubr.msk.bf16.vlgmr.msra.gmra.mrb[12].mxu1 %vm86_vm0, %v414_v38 }
 0x883   :  { %1869 = vmatpush3.bf16.msra.mxu1 %v2198_v6  ;;  %1872 = vmatprep.mubr.msk.bf16.mxu1 %vm2132_vm1, %v2131_v7 }
 0x884   :  { %1870 = vmatprep.subr.bf16.mxu1 %v2131_v7 }
 0x887   :  { %1871 = vmatpush3.bf16.msra.mxu1 %v2209_v8 }
 0x888   :  { %1884 = vmatprep.subr.bf16.mxu1 %v2131_v7 }
 0x955   :  { %v455_v39 = vpop.f32.mrb[12].mxu1 }
 0x956   :  { %v461_v40 = vadd.f32 %v455_v39, %v2240_v22  ;;  %v1858_v41 = vpop.f32.mrb[13].mxu1 }
 0x957   :  { %v458_v42 = vpop.f32.mrb[14].mxu1 }
 0x958   :  { %v1700_v43 = vmul.f32 -1.442695, %v461_v40  ;;  %v1859_v44 = vpop.f32.mrb[15].mxu1 }
 0x95a   :  { %2027 = vpow2.f32 %v1700_v43 }
 0x95b   :  { %2029 = vtanh.f32 %v461_v40 }
 0x964   :  { %v2028_v45 = vpop.eup %2027 }
 0x965   :  { %v465_v46 = vadd.f32 1.0, %v2028_v45  ;;  %v2030_v47 = vpop.eup %2029 }
 0x967   :  { %2031 = vrcp.f32 %v465_v46 }
 0x971   :  { %v2032_v48 = vpop.eup %2031 }
 0x972   :  { %v469_v49 = vsel %vm2244_vm4, %v2030_v47, %v2032_v48 }
 0x973   :  { %472 = vrot.lane.b32.xlu0 %v469_v49, %s2134_s18  ;;  %v470_v22 = vmul.f32 %v469_v49, %v404_v32 }
 0x9e5   :  { %v473_v50 = vpop.permute.xlu0 %472 }
 0x9e6   :  { %v475_v51 = vmul.f32 %v473_v50, %v469_v49 }
 0x9e8   :  { %477 = vrot.lane.b32.xlu1 %v475_v51, %s2135_s19 }
 0xa5a   :  { %v478_v52 = vpop.permute.xlu1 %477 }
 0xa5b   :  { %v480_v53 = vadd.f32 %v478_v52, %v470_v22 }
 0xa5d   :  { %2033 = vtanh.f32 %v480_v53 }
 0xa67   :  { %v2034_v54 = vpop.eup %2033 }
 0xa68   :  { %483 = vrot.lane.b32.xlu0 %v2034_v54, %s2134_s18 }
 0xada   :  { %v484_v55 = vpop.permute.xlu0 %483 }
 0xadb   :  { %v486_v56 = vmul.f32 %v484_v55, %v469_v49 }
 0xadd   :  { %v2299_v57 = vpack.c.bf16 %v486_v56, %v486_v56 }
 0xadf   :  { %495 = vrot.lane.b32.xlu1 %v2299_v57, %s2135_s19 }
 0xb51   :  { %v496_v58 = vpop.permute.xlu1 %495 }
 0xb52   :  { %1865 = vmatmul.mubr.msk.bf16.vlgmr.msra.gmra.mrb[8].mxu0 %vm86_vm0, %v496_v58 }
 0xb53   :  { %1877 = vmatpush3.bf16.msra.mxu0 %v2198_v6  ;;  %1880 = vmatprep.mubr.msk.bf16.mxu0 %vm2132_vm1, %v2131_v7 }
 0xb54   :  { %1878 = vmatprep.subr.bf16.mxu0 %v2131_v7 }
 0xb57   :  { %1879 = vmatpush3.bf16.msra.mxu0 %v2209_v8 }
 0xc25   :  { %v534_v59 = vpop.f32.mrb[8].mxu0 }
 0xc26   :  { %v540_v60 = vadd.f32 %v534_v59, %v2236_v17  ;;  %v1866_v61 = vpop.f32.mrb[9].mxu0 }
 0xc27   :  { %v537_v62 = vpop.f32.mrb[10].mxu0 }
 0xc28   :  { %v1702_v63 = vmul.f32 -1.442695, %v540_v60  ;;  %v1867_v0 = vpop.f32.mrb[11].mxu0 }
 0xc29   :  { %v489_v0 = vrot.slane %v2299_v57, 4  ;;  %v2370_v57 = vld [vmem:[%s2595_s2 + $0x18] sm:$0xff]  }
 0xc2a   :  { %2035 = vpow2.f32 %v1702_v63 }
 0xc2b   :  { %2037 = vtanh.f32 %v540_v60  ;;  %v1997_v60 = vld [vmem:[%s2593_s1 + $0x10] sm:$0xff]  }
 0xc2c   :  { %1892 = vmatprep.subr.bf16.mxu0 %v1997_v60 }
 0xc34   :  { %v2036_v1 = vpop.eup %2035 }
 0xc35   :  { %v544_v2 = vadd.f32 1.0, %v2036_v1  ;;  %v2038_v3 = vpop.eup %2037 }
 0xc37   :  { %2039 = vrcp.f32 %v544_v2 }
 0xc41   :  { %v2040_v4 = vpop.eup %2039 }
 0xc42   :  { %v548_v5 = vsel %vm2244_vm4, %v2038_v3, %v2040_v4 }
 0xc43   :  { %551 = vrot.lane.b32.xlu0 %v548_v5, %s2134_s18  ;;  %v549_v17 = vmul.f32 %v548_v5, %v480_v53 }
 0xcb5   :  { %v552_v11 = vpop.permute.xlu0 %551 }
 0xcb6   :  { %v554_v12 = vmul.f32 %v552_v11, %v548_v5  ;;  %v2362_v11 = vld [vmem:[%s2595_s2 + $0x10] sm:$0xff]  }
 0xcb8   :  { %556 = vrot.lane.b32.xlu1 %v554_v12, %s2135_s19 }
 0xd2a   :  { %v557_v14 = vpop.permute.xlu1 %556 }
 0xd2b   :  { %v559_v16 = vadd.f32 %v557_v14, %v549_v17 }
 0xd2d   :  { %2041 = vtanh.f32 %v559_v16 }
 0xd37   :  { %v2042_v18 = vpop.eup %2041 }
 0xd38   :  { %562 = vrot.lane.b32.xlu0 %v2042_v18, %s2134_s18 }
 0xdaa   :  { %v563_v19 = vpop.permute.xlu0 %562 }
 0xdab   :  { %v565_v21 = vmul.f32 %v563_v19, %v548_v5 }
 0xdad   :  { %v566_v23 = vpack.c.bf16 %v565_v21, %v565_v21 }
 0xdaf   :  { %568 = vrot.lane.b32.xlu1 %v566_v23, %s2135_s19 }
 0xe21   :  { %v569_v25 = vpop.permute.xlu1 %568 }
 0xe22   :  { %571 = vst.msk [vmem:[#allocation3 + $0x10] sm:$0xf] %vm259_vm5, %v569_v25  ;;  %1873 = vmatmul.mubr.msk.bf16.vlgmr.msra.gmra.mrb[16].mxu1 %vm86_vm0, %v569_v25 }
 0xe23   :  { %1885 = vmatpush3.bf16.msra.mxu1 %v2198_v6  ;;  %1888 = vmatprep.mubr.msk.bf16.mxu1 %vm2132_vm1, %v2131_v7 }
 0xe24   :  { %1886 = vmatprep.subr.bf16.mxu1 %v2131_v7 }
 0xe27   :  { %1887 = vmatpush3.bf16.msra.mxu1 %v2209_v8 }
 0xe28   :  { %1904 = vmatprep.subr.bf16.mxu1 %v2131_v7 }
 0xef5   :  { %v610_v26 = vpop.f32.mrb[16].mxu1 }
 0xef6   :  { %v616_v27 = vadd.f32 %v610_v26, %v2242_v24  ;;  %v1874_v28 = vpop.f32.mrb[17].mxu1  ;;  %v2399_v26 = vld [vmem:[%s2596_s3 + $0x1] ss:$0 sm:$0xff] }
 0xef7   :  { %v613_v29 = vpop.f32.mrb[18].mxu1 }
 0xef8   :  { %v1704_v30 = vmul.f32 -1.442695, %v616_v27  ;;  %v1875_v15 = vpop.f32.mrb[19].mxu1 }
 0xefa   :  { %2043 = vpow2.f32 %v1704_v30 }
 0xefb   :  { %2045 = vtanh.f32 %v616_v27 }
 0xf04   :  { %v2044_v31 = vpop.eup %2043 }
 0xf05   :  { %v620_v32 = vadd.f32 1.0, %v2044_v31  ;;  %v2046_v6 = vpop.eup %2045 }
 0xf07   :  { %2047 = vrcp.f32 %v620_v32 }
 0xf11   :  { %v2048_v33 = vpop.eup %2047 }
 0xf12   :  { %v624_v34 = vsel %vm2244_vm4, %v2046_v6, %v2048_v33 }
 0xf13   :  { %627 = vrot.lane.b32.xlu0 %v624_v34, %s2134_s18  ;;  %v625_v24 = vmul.f32 %v624_v34, %v559_v16 }
 0xf85   :  { %v628_v8 = vpop.permute.xlu0 %627 }
 0xf86   :  { %v630_v35 = vmul.f32 %v628_v8, %v624_v34 }
 0xf88   :  { %632 = vrot.lane.b32.xlu1 %v630_v35, %s2135_s19 }
 0xffa   :  { %v633_v36 = vpop.permute.xlu1 %632 }
 0xffb   :  { %v635_v38 = vadd.f32 %v633_v36, %v625_v24 }
 0xffd   :  { %2049 = vtanh.f32 %v635_v38 }
0x1007   :  { %v2050_v39 = vpop.eup %2049 }
0x1008   :  { %638 = vrot.lane.b32.xlu0 %v2050_v39, %s2134_s18 }
0x107a   :  { %v639_v40 = vpop.permute.xlu0 %638 }
0x107b   :  { %v641_v41 = vmul.f32 %v639_v40, %v624_v34 }
0x107d   :  { %v2330_v42 = vpack.c.bf16 %v641_v41, %v641_v41 }
0x107f   :  { %650 = vrot.lane.b32.xlu1 %v2330_v42, %s2135_s19 }
0x10f1   :  { %v651_v43 = vpop.permute.xlu1 %650 }
0x10f2   :  { %1881 = vmatmul.mubr.msk.bf16.vlgmr.msra.gmra.mrb[12].mxu0 %vm86_vm0, %v651_v43 }
0x10f3   :  { %1893 = vmatpush3.bf16.msra.mxu0 %v1997_v60 }
0x11c5   :  { %v689_v44 = vpop.f32.mrb[12].mxu0 }
0x11c6   :  { %v695_v45 = vadd.f32 %v689_v44, %v2232_v13  ;;  %v1882_v46 = vpop.f32.mrb[13].mxu0  ;;  %v333_v13 = vrot.slane %v2267_v10, 4  ;;  %v1998_v10 = vld [vmem:[%s2593_s1 + $0x18] sm:$0xff]  }
0x11c7   :  { %v692_v47 = vpop.f32.mrb[14].mxu0  ;;  %1894 = vmatprep.subr.bf16.mxu0 %v1998_v10 }
0x11c8   :  { %v1706_v48 = vmul.f32 -1.442695, %v695_v45  ;;  %v1883_v49 = vpop.f32.mrb[15].mxu0  ;;  %1895 = vmatpush3.bf16.msra.mxu0 %v1998_v10 }
0x11c9   :  { %1920 = vmatprep.subr.bf16.mxu0 %v2131_v7 }
0x11ca   :  { %2051 = vpow2.f32 %v1706_v48 }
0x11cb   :  { %2053 = vtanh.f32 %v695_v45 }
0x11d4   :  { %v2052_v50 = vpop.eup %2051 }
0x11d5   :  { %v699_v51 = vadd.f32 1.0, %v2052_v50  ;;  %v2054_v22 = vpop.eup %2053 }
0x11d7   :  { %2055 = vrcp.f32 %v699_v51 }
0x11e1   :  { %v2056_v52 = vpop.eup %2055 }
0x11e2   :  { %v703_v53 = vsel %vm2244_vm4, %v2054_v22, %v2056_v52 }
0x11e3   :  { %706 = vrot.lane.b32.xlu0 %v703_v53, %s2134_s18  ;;  %v704_v56 = vmul.f32 %v703_v53, %v635_v38 }
0x1255   :  { %v707_v54 = vpop.permute.xlu0 %706 }
0x1256   :  { %v709_v55 = vmul.f32 %v707_v54, %v703_v53 }
0x1258   :  { %711 = vrot.lane.b32.xlu1 %v709_v55, %s2135_s19 }
0x125c   :  { %334 = vrot.lane.b32.xlu1 %v333_v13, %s2135_s19 }
0x12ca   :  { %v712_v58 = vpop.permute.xlu1 %711 }
0x12cb   :  { %v2342_v59 = vadd.f32 %v712_v58, %v704_v56  ;;  %v644_v56 = vrot.slane %v2330_v42, 4 }
0x12cd   :  { %2057 = vtanh.f32 %v2342_v59 }
0x12ce   :  { %v335_v61 = vpop.permute.xlu1 %334 }
0x12cf   :  { %338 = vst.msk [vmem:[#allocation3] sm:$0xf0] %vm337_vm6, %v335_v61 }
0x12d6   :  { %v821_v62 = vld [vmem:[#allocation3] sm:$0xff] }
0x12d7   :  { %v2058_v63 = vpop.eup %2057  ;;  %1896 = vmatprep.mubr.msk.bf16.mxu0 %vm86_vm0, %v821_v62 }
0x12d8   :  { %717 = vrot.lane.b32.xlu0 %v2058_v63, %s2134_s18 }
0x12dc   :  { %490 = vrot.lane.b32.xlu0 %v489_v0, %s2135_s19 }
0x134a   :  { %v718_v1 = vpop.permute.xlu0 %717 }
0x134b   :  { %v720_v2 = vmul.f32 %v718_v1, %v703_v53 }
0x134d   :  { %v721_v3 = vpack.c.bf16 %v720_v2, %v720_v2 }
0x134e   :  { %v491_v4 = vpop.permute.xlu0 %490 }
0x134f   :  { %493 = vst.msk [vmem:[#allocation3 + $0x8] sm:$0xf0] %vm337_vm6, %v491_v4  ;;  %723 = vrot.lane.b32.xlu1 %v721_v3, %s2135_s19 }
0x1356   :  { %v822_v5 = vld [vmem:[#allocation3 + $0x8] sm:$0xff] }
0x1357   :  { %1897 = vmatmul.mubr.msk.bf16.vlgmr.msra.gmra.mrb[16].mxu0 %vm86_vm0, %v822_v5 }
0x1358   :  { %1921 = vmatpush3.bf16.msra.mxu0 %v2362_v11 }
0x1359   :  { %1922 = vmatprep.subr.bf16.mxu0 %v2131_v7 }
0x135c   :  { %1923 = vmatpush3.bf16.msra.mxu0 %v2370_v57 }
0x135d   :  { %1936 = vmatprep.subr.bf16.mxu0 %v2131_v7 }
0x13c1   :  { %v724_v12 = vpop.permute.xlu1 %723 }
0x13c2   :  { %726 = vst.msk [vmem:[#allocation3 + $0x18] sm:$0xf] %vm259_vm5, %v724_v12  ;;  %1889 = vmatmul.mubr.msk.bf16.vlgmr.msra.gmra.mrb[20].mxu1 %vm86_vm0, %v724_v12 }
0x13c3   :  { %1905 = vmatpush3.bf16.msra.mxu1 %v2362_v11  ;;  %1908 = vmatprep.mubr.msk.bf16.mxu1 %vm2132_vm1, %v2131_v7 }
0x13c4   :  { %1906 = vmatprep.subr.bf16.mxu1 %v2131_v7 }
0x13c7   :  { %1907 = vmatpush3.bf16.msra.mxu1 %v2370_v57 }
0x13c8   :  { %1912 = vmatprep.subr.bf16.mxu1 %v2131_v7 }
0x13ca   :  { %1909 = vmatmul.mubr.bf16.vlgmr.msra.gmra.mrb[24].mxu1 %v2133_v9 }
0x13cb   :  { %1913 = vmatpush3.bf16.msra.mxu1 %v2362_v11  ;;  %1916 = vmatprep.mubr.msk.bf16.mxu1 %vm2132_vm1, %v2131_v7 }
0x13cc   :  { %1914 = vmatprep.subr.bf16.mxu1 %v2131_v7 }
0x13cf   :  { %1915 = vmatpush3.bf16.msra.mxu1 %v2370_v57 }
0x13d0   :  { %1928 = vmatprep.subr.bf16.mxu1 %v2131_v7 }
0x142a   :  { %v2389_v17 = vpop.f32.mrb[16].mxu0 }
0x142b   :  { %v889_v14 = vpop.f32.mrb[17].mxu0 }
0x142c   :  { %v2391_v16 = vpop.f32.mrb[18].mxu0  ;;  %v890_v27 = vadd.f32 %v2399_v26, %v889_v14 }
0x142d   :  { %v2393_v18 = vpop.f32.mrb[19].mxu0 }
0x142e   :  { %v893_v61 = vadd.f32 %v2399_v26, %v2393_v18 }
0x1495   :  { %v765_v19 = vpop.f32.mrb[20].mxu1 }
0x1496   :  { %v771_v9 = vadd.f32 %v765_v19, %v2238_v20  ;;  %v1890_v21 = vpop.f32.mrb[21].mxu1 }
0x1497   :  { %v768_v23 = vpop.f32.mrb[22].mxu1 }
0x1498   :  { %v1891_v25 = vpop.f32.mrb[23].mxu1  ;;  %v1708_v36 = vmul.f32 -1.442695, %v771_v9 }
0x149d   :  { %v975_v28 = vpop.f32.mrb[24].mxu1 }
0x149e   :  { %v981_v29 = vadd.f32 %v975_v28, %v890_v27  ;;  %v1910_v30 = vpop.f32.mrb[25].mxu1 }
0x149f   :  { %v978_v15 = vpop.f32.mrb[26].mxu1 }
0x14a0   :  { %v1727_v31 = vmul.f32 -1.442695, %v981_v29  ;;  %v1911_v32 = vpop.f32.mrb[27].mxu1 }
0x14a2   :  { %2059 = vpow2.f32 %v1727_v31 }
0x14a3   :  { %2061 = vtanh.f32 %v981_v29 }
0x14ac   :  { %v2060_v6 = vpop.eup %2059 }
0x14ad   :  { %v985_v33 = vadd.f32 1.0, %v2060_v6  ;;  %v2062_v20 = vpop.eup %2061 }
0x14af   :  { %2063 = vrcp.f32 %v985_v33 }
0x14b0   :  { %2065 = vpow2.f32 %v1708_v36 }
0x14b9   :  { %v2064_v34 = vpop.eup %2063 }
0x14ba   :  { %v989_v8 = vsel %vm2244_vm4, %v2062_v20, %v2064_v34  ;;  %v2066_v38 = vpop.eup %2065 }
0x14bb   :  { %992 = vrot.lane.b32.xlu0 %v989_v8, %s2134_s18  ;;  %v990_v39 = vmul.f32 0.0, %v989_v8  ;;  %v775_v40 = vadd.f32 1.0, %v2066_v38 }
0x152d   :  { %v993_v35 = vpop.permute.xlu0 %992 }
0x152e   :  { %v995_v24 = vmul.f32 %v993_v35, %v989_v8  ;;  %v898_v35 = vadd.f32 %v2389_v17, %v2399_v26 }
0x1530   :  { %997 = vrot.lane.b32.xlu1 %v995_v24, %s2135_s19 }
0x15a2   :  { %v998_v41 = vpop.permute.xlu1 %997 }
0x15a3   :  { %v1000_v43 = vadd.f32 %v998_v41, %v990_v39 }
0x15a5   :  { %2067 = vtanh.f32 %v1000_v43 }
0x15a6   :  { %2069 = vrcp.f32 %v775_v40 }
0x15a7   :  { %2071 = vtanh.f32 %v771_v9 }
0x15af   :  { %v2068_v44 = vpop.eup %2067 }
0x15b0   :  { %v2070_v45 = vpop.eup %2069  ;;  %1003 = vrot.lane.b32.xlu0 %v2068_v44, %s2134_s18 }
0x15b1   :  { %v2072_v46 = vpop.eup %2071 }
0x15b2   :  { %v779_v47 = vsel %vm2244_vm4, %v2072_v46, %v2070_v45 }
0x15b3   :  { %v780_v53 = vmul.f32 %v779_v47, %v2342_v59 }
0x15b4   :  { %782 = vrot.lane.b32.xlu0 %v779_v47, %s2134_s18 }
0x1622   :  { %v1004_v48 = vpop.permute.xlu0 %1003 }
0x1623   :  { %v1006_v49 = vmul.f32 %v1004_v48, %v989_v8 }
0x1625   :  { %v1007_v50 = vpack.c.bf16 %v1006_v49, %v1006_v49 }
0x1626   :  { %v783_v51 = vpop.permute.xlu0 %782 }
0x1627   :  { %v785_v22 = vmul.f32 %v783_v51, %v779_v47  ;;  %1009 = vrot.lane.b32.xlu1 %v1007_v50, %s2135_s19 }
0x1629   :  { %787 = vrot.lane.b32.xlu0 %v785_v22, %s2135_s19 }
0x1699   :  { %v1010_v52 = vpop.permute.xlu1 %1009 }
0x169a   :  { %1012 = vst.msk [vmem:[#allocation3] sm:$0xf] %vm259_vm5, %v1010_v52  ;;  %1917 = vmatmul.mubr.msk.bf16.vlgmr.msra.gmra.mrb[28].mxu1 %vm86_vm0, %v1010_v52 }
0x169b   :  { %v788_v54 = vpop.permute.xlu0 %787  ;;  %1929 = vmatpush3.bf16.msra.mxu1 %v2362_v11  ;;  %1932 = vmatprep.mubr.msk.bf16.mxu1 %vm2132_vm1, %v2131_v7 }
0x169c   :  { %v790_v55 = vadd.f32 %v788_v54, %v780_v53  ;;  %1930 = vmatprep.subr.bf16.mxu1 %v2131_v7 }
0x169e   :  { %2073 = vtanh.f32 %v790_v55 }
0x169f   :  { %1931 = vmatpush3.bf16.msra.mxu1 %v2370_v57 }
0x16a0   :  { %1944 = vmatprep.subr.bf16.mxu1 %v2131_v7 }
0x16a8   :  { %v2074_v13 = vpop.eup %2073 }
0x16a9   :  { %793 = vrot.lane.b32.xlu0 %v2074_v13, %s2134_s18  ;;  %v901_v13 = vadd.f32 %v2391_v16, %v2399_v26 }
0x16ad   :  { %645 = vrot.lane.b32.xlu0 %v644_v56, %s2135_s19 }
0x171b   :  { %v794_v58 = vpop.permute.xlu0 %793 }
0x171c   :  { %v2432_v23 = vmul.f32 %v794_v58, %v779_v47 }
0x171e   :  { %v797_v25 = vpack.c.bf16 %v2432_v23, %v2432_v23 }
0x171f   :  { %v646_v59 = vpop.permute.xlu0 %645 }
0x1720   :  { %648 = vst.msk [vmem:[#allocation3 + $0x10] sm:$0xf0] %vm337_vm6, %v646_v59  ;;  %v799_v28 = vrot.slane %v797_v25, 4 }
0x1727   :  { %v823_v60 = vld [vmem:[#allocation3 + $0x10] sm:$0xff] }
0x1728   :  { %1900 = vmatprep.mubr.msk.bf16.mxu0 %vm86_vm0, %v823_v60 }
0x176d   :  { %v1051_v10 = vpop.f32.mrb[28].mxu1 }
0x176e   :  { %v1057_v62 = vadd.f32 %v1051_v10, %v893_v61  ;;  %v1918_v63 = vpop.f32.mrb[29].mxu1 }
0x176f   :  { %v1054_v0 = vpop.f32.mrb[30].mxu1 }
0x1770   :  { %v1729_v1 = vmul.f32 -1.442695, %v1057_v62  ;;  %v1919_v2 = vpop.f32.mrb[31].mxu1 }
0x1772   :  { %2075 = vpow2.f32 %v1729_v1 }
0x1773   :  { %2077 = vtanh.f32 %v1057_v62 }
0x177c   :  { %v2076_v42 = vpop.eup %2075 }
0x177d   :  { %v1061_v3 = vadd.f32 1.0, %v2076_v42  ;;  %v2078_v4 = vpop.eup %2077 }
0x177f   :  { %2079 = vrcp.f32 %v1061_v3 }
0x1789   :  { %v2080_v5 = vpop.eup %2079 }
0x178a   :  { %v1065_v12 = vsel %vm2244_vm4, %v2078_v4, %v2080_v5 }
0x178b   :  { %1068 = vrot.lane.b32.xlu1 %v1065_v12, %s2134_s18  ;;  %v1066_v19 = vmul.f32 %v1065_v12, %v1000_v43 }
0x17fd   :  { %v1069_v14 = vpop.permute.xlu1 %1068 }
0x17fe   :  { %v1071_v18 = vmul.f32 %v1069_v14, %v1065_v12 }
0x1800   :  { %1073 = vrot.lane.b32.xlu1 %v1071_v18, %s2135_s19 }
0x1872   :  { %v1074_v9 = vpop.permute.xlu1 %1073 }
0x1873   :  { %v1076_v21 = vadd.f32 %v1074_v9, %v1066_v19 }
0x1875   :  { %2081 = vtanh.f32 %v1076_v21 }
0x187f   :  { %v2082_v27 = vpop.eup %2081 }
0x1880   :  { %1079 = vrot.lane.b32.xlu1 %v2082_v27, %s2134_s18 }
0x1884   :  { %800 = vrot.lane.b32.xlu1 %v799_v28, %s2135_s19 }
0x18f2   :  { %v1080_v29 = vpop.permute.xlu1 %1079 }
0x18f3   :  { %v1082_v30 = vmul.f32 %v1080_v29, %v1065_v12 }
0x18f5   :  { %v2438_v15 = vpack.c.bf16 %v1082_v30, %v1082_v30 }
0x18f6   :  { %v801_v31 = vpop.permute.xlu1 %800 }
0x18f7   :  { %803 = vst.msk [vmem:[#allocation3 + $0x18] sm:$0xf0] %vm337_vm6, %v801_v31  ;;  %1091 = vrot.lane.b32.xlu0 %v2438_v15, %s2135_s19 }
0x18fe   :  { %v824_v32 = vld [vmem:[#allocation3 + $0x18] sm:$0xff] }
0x18ff   :  { %1901 = vmatmul.mubr.msk.bf16.gmra.mrb[20].mxu0 %vm86_vm0, %v824_v32 }
0x1900   :  { %1924 = vmatprep.mubr.msk.bf16.mxu0 %vm2132_vm1, %v2131_v7 }
0x1969   :  { %v1092_v6 = vpop.permute.xlu0 %1091 }
0x196a   :  { %1925 = vmatmul.mubr.msk.bf16.vlgmr.msra.gmra.mrb[24].mxu0 %vm86_vm0, %v1092_v6 }
0x196b   :  { %1937 = vmatpush3.bf16.msra.mxu0 %v2362_v11  ;;  %1940 = vmatprep.mubr.msk.bf16.mxu0 %vm2132_vm1, %v2131_v7 }
0x196c   :  { %1938 = vmatprep.subr.bf16.mxu0 %v2131_v7 }
0x196f   :  { %1939 = vmatpush3.bf16.msra.mxu0 %v2370_v57 }
0x1970   :  { %1952 = vmatprep.subr.bf16.mxu0 %v2131_v7 }
0x19d2   :  { %v2453_v33 = vpop.f32.mrb[20].mxu0 }
0x19d3   :  { %v2455_v20 = vpop.f32.mrb[21].mxu0 }
0x19d4   :  { %v2457_v34 = vpop.f32.mrb[22].mxu0 }
0x19d5   :  { %v2459_v8 = vpop.f32.mrb[23].mxu0 }
0x1a3d   :  { %v1130_v24 = vpop.f32.mrb[24].mxu0 }
0x1a3e   :  { %v1136_v36 = vadd.f32 %v1130_v24, %v898_v35  ;;  %v1926_v38 = vpop.f32.mrb[25].mxu0 }
0x1a3f   :  { %v1133_v39 = vpop.f32.mrb[26].mxu0 }
0x1a40   :  { %v1731_v40 = vmul.f32 -1.442695, %v1136_v36  ;;  %v1927_v41 = vpop.f32.mrb[27].mxu0 }
0x1a42   :  { %2083 = vpow2.f32 %v1731_v40 }
0x1a43   :  { %2085 = vtanh.f32 %v1136_v36 }
0x1a4c   :  { %v2084_v43 = vpop.eup %2083 }
0x1a4d   :  { %v1140_v44 = vadd.f32 1.0, %v2084_v43  ;;  %v2086_v45 = vpop.eup %2085 }
0x1a4f   :  { %2087 = vrcp.f32 %v1140_v44 }
0x1a59   :  { %v2088_v46 = vpop.eup %2087 }
0x1a5a   :  { %v1144_v47 = vsel %vm2244_vm4, %v2086_v45, %v2088_v46 }
0x1a5b   :  { %1147 = vrot.lane.b32.xlu1 %v1144_v47, %s2134_s18  ;;  %v1145_v49 = vmul.f32 %v1144_v47, %v1076_v21  ;;  %v906_v21 = vadd.f32 %v2399_v26, %v2455_v20 }
0x1acd   :  { %v1148_v48 = vpop.permute.xlu1 %1147 }
0x1ace   :  { %v1150_v17 = vmul.f32 %v1148_v48, %v1144_v47  ;;  %v909_v48 = vadd.f32 %v2399_v26, %v2459_v8 }
0x1ad0   :  { %1152 = vrot.lane.b32.xlu0 %v1150_v17, %s2135_s19 }
0x1b42   :  { %v1153_v50 = vpop.permute.xlu0 %1152 }
0x1b43   :  { %v1155_v51 = vadd.f32 %v1153_v50, %v1145_v49 }
0x1b45   :  { %2089 = vtanh.f32 %v1155_v51 }
0x1b4f   :  { %v2090_v22 = vpop.eup %2089 }
0x1b50   :  { %1158 = vrot.lane.b32.xlu1 %v2090_v22, %s2134_s18 }
0x1bc2   :  { %v1159_v52 = vpop.permute.xlu1 %1158 }
0x1bc3   :  { %v1161_v53 = vmul.f32 %v1159_v52, %v1144_v47 }
0x1bc5   :  { %v1162_v54 = vpack.c.bf16 %v1161_v53, %v1161_v53 }
0x1bc7   :  { %1164 = vrot.lane.b32.xlu0 %v1162_v54, %s2135_s19 }
0x1c39   :  { %v1165_v55 = vpop.permute.xlu0 %1164 }
0x1c3a   :  { %1167 = vst.msk [vmem:[#allocation3 + $0x8] sm:$0xf] %vm259_vm5, %v1165_v55  ;;  %1933 = vmatmul.mubr.msk.bf16.vlgmr.msra.gmra.mrb[32].mxu1 %vm86_vm0, %v1165_v55 }
0x1c3b   :  { %1945 = vmatpush3.bf16.msra.mxu1 %v2362_v11  ;;  %1948 = vmatprep.mubr.msk.bf16.mxu1 %vm2132_vm1, %v2131_v7 }
0x1c3c   :  { %1946 = vmatprep.subr.bf16.mxu1 %v2131_v7 }
0x1c3f   :  { %1947 = vmatpush3.bf16.msra.mxu1 %v2370_v57 }
0x1c40   :  { %1960 = vmatprep.subr.bf16.mxu1 %v2131_v7 }
0x1d0d   :  { %v1206_v56 = vpop.f32.mrb[32].mxu1 }
0x1d0e   :  { %v1212_v58 = vadd.f32 %v1206_v56, %v901_v13  ;;  %v1934_v59 = vpop.f32.mrb[33].mxu1 }
0x1d0f   :  { %v1209_v60 = vpop.f32.mrb[34].mxu1 }
0x1d10   :  { %v1733_v61 = vmul.f32 -1.442695, %v1212_v58  ;;  %v1935_v10 = vpop.f32.mrb[35].mxu1 }
0x1d12   :  { %2091 = vpow2.f32 %v1733_v61 }
0x1d13   :  { %2093 = vtanh.f32 %v1212_v58 }
0x1d1c   :  { %v2092_v62 = vpop.eup %2091 }
0x1d1d   :  { %v1216_v63 = vadd.f32 1.0, %v2092_v62  ;;  %v2094_v0 = vpop.eup %2093 }
0x1d1f   :  { %2095 = vrcp.f32 %v1216_v63  ;;  %v914_v63 = vadd.f32 %v2453_v33, %v2399_v26 }
0x1d29   :  { %v2096_v1 = vpop.eup %2095 }
0x1d2a   :  { %v1220_v2 = vsel %vm2244_vm4, %v2094_v0, %v2096_v1 }
0x1d2b   :  { %1223 = vrot.lane.b32.xlu1 %v1220_v2, %s2134_s18  ;;  %v1221_v3 = vmul.f32 %v1220_v2, %v1155_v51 }
0x1d9d   :  { %v1224_v42 = vpop.permute.xlu1 %1223 }
0x1d9e   :  { %v1226_v16 = vmul.f32 %v1224_v42, %v1220_v2 }
0x1da0   :  { %1228 = vrot.lane.b32.xlu0 %v1226_v16, %s2135_s19 }
0x1e12   :  { %v1229_v4 = vpop.permute.xlu0 %1228 }
0x1e13   :  { %v1231_v5 = vadd.f32 %v1229_v4, %v1221_v3 }
0x1e15   :  { %2097 = vtanh.f32 %v1231_v5 }
0x1e1f   :  { %v2098_v12 = vpop.eup %2097 }
0x1e20   :  { %1234 = vrot.lane.b32.xlu1 %v2098_v12, %s2134_s18 }
0x1e92   :  { %v1235_v14 = vpop.permute.xlu1 %1234 }
0x1e93   :  { %v1237_v18 = vmul.f32 %v1235_v14, %v1220_v2 }
0x1e95   :  { %v2484_v19 = vpack.c.bf16 %v1237_v18, %v1237_v18 }
0x1e97   :  { %1246 = vrot.lane.b32.xlu0 %v2484_v19, %s2135_s19 }
0x1f09   :  { %v1247_v9 = vpop.permute.xlu0 %1246 }
0x1f0a   :  { %1941 = vmatmul.mubr.msk.bf16.vlgmr.msra.gmra.mrb[28].mxu0 %vm86_vm0, %v1247_v9 }
0x1f0b   :  { %1953 = vmatpush3.bf16.msra.mxu0 %v2362_v11  ;;  %1956 = vmatprep.mubr.msk.bf16.mxu0 %vm2132_vm1, %v2131_v7 }
0x1f0c   :  { %1954 = vmatprep.subr.bf16.mxu0 %v2131_v7 }
0x1f0f   :  { %1955 = vmatpush3.bf16.msra.mxu0 %v2370_v57 }
0x1fdd   :  { %v1285_v25 = vpop.f32.mrb[28].mxu0 }
0x1fde   :  { %v1291_v27 = vadd.f32 %v1285_v25, %v906_v21  ;;  %v1942_v28 = vpop.f32.mrb[29].mxu0 }
0x1fdf   :  { %v1288_v29 = vpop.f32.mrb[30].mxu0 }
0x1fe0   :  { %v1735_v30 = vmul.f32 -1.442695, %v1291_v27  ;;  %v1943_v31 = vpop.f32.mrb[31].mxu0 }
0x1fe2   :  { %2099 = vpow2.f32 %v1735_v30 }
0x1fe3   :  { %2101 = vtanh.f32 %v1291_v27 }
0x1fec   :  { %v2100_v32 = vpop.eup %2099 }
0x1fed   :  { %v1295_v6 = vadd.f32 1.0, %v2100_v32  ;;  %v2102_v35 = vpop.eup %2101 }
0x1fef   :  { %2103 = vrcp.f32 %v1295_v6  ;;  %v917_v6 = vadd.f32 %v2457_v34, %v2399_v26  ;;  %v1085_v34 = vrot.slane %v2438_v15, 4  ;;  %v2002_v15 = vld [vmem:[%s2597_s4 + $0x8] sm:$0xff]  }
0x1ff9   :  { %v2104_v24 = vpop.eup %2103 }
0x1ffa   :  { %v1299_v36 = vsel %vm2244_vm4, %v2102_v35, %v2104_v24 }
0x1ffb   :  { %1302 = vrot.lane.b32.xlu1 %v1299_v36, %s2134_s18  ;;  %v1300_v39 = vmul.f32 %v1299_v36, %v1231_v5 }
0x206d   :  { %v1303_v38 = vpop.permute.xlu1 %1302 }
0x206e   :  { %v1305_v20 = vmul.f32 %v1303_v38, %v1299_v36 }
0x2070   :  { %1307 = vrot.lane.b32.xlu0 %v1305_v20, %s2135_s19 }
0x20e2   :  { %v1308_v40 = vpop.permute.xlu0 %1307 }
0x20e3   :  { %v1310_v41 = vadd.f32 %v1308_v40, %v1300_v39 }
0x20e5   :  { %2105 = vtanh.f32 %v1310_v41 }
0x20ef   :  { %v2106_v43 = vpop.eup %2105 }
0x20f0   :  { %1313 = vrot.lane.b32.xlu1 %v2106_v43, %s2134_s18 }
0x2162   :  { %v1314_v44 = vpop.permute.xlu1 %1313 }
0x2163   :  { %v1316_v45 = vmul.f32 %v1314_v44, %v1299_v36 }
0x2165   :  { %v1317_v46 = vpack.c.bf16 %v1316_v45, %v1316_v45 }
0x2167   :  { %1319 = vrot.lane.b32.xlu0 %v1317_v46, %s2135_s19 }
0x21d9   :  { %v1320_v47 = vpop.permute.xlu0 %1319 }
0x21da   :  { %1322 = vst.msk [vmem:[#allocation3 + $0x10] sm:$0xf] %vm259_vm5, %v1320_v47  ;;  %1949 = vmatmul.mubr.msk.bf16.vlgmr.msra.gmra.mrb[36].mxu1 %vm86_vm0, %v1320_v47 }
0x21db   :  { %1961 = vmatpush3.bf16.msra.mxu1 %v2362_v11  ;;  %1964 = vmatprep.mubr.msk.bf16.mxu1 %vm2132_vm1, %v2131_v7 }
0x21dc   :  { %1962 = vmatprep.subr.bf16.mxu1 %v2131_v7 }
0x21df   :  { %1963 = vmatpush3.bf16.msra.mxu1 %v2370_v57 }
0x22ad   :  { %v1361_v17 = vpop.f32.mrb[36].mxu1 }
0x22ae   :  { %v1367_v49 = vadd.f32 %v1361_v17, %v909_v48  ;;  %v1950_v50 = vpop.f32.mrb[37].mxu1 }
0x22af   :  { %v1364_v51 = vpop.f32.mrb[38].mxu1 }
0x22b0   :  { %v1737_v22 = vmul.f32 -1.442695, %v1367_v49  ;;  %v1951_v52 = vpop.f32.mrb[39].mxu1 }
0x22b2   :  { %2107 = vpow2.f32 %v1737_v22 }
0x22b3   :  { %2109 = vtanh.f32 %v1367_v49  ;;  %v2001_v49 = vld [vmem:[%s2597_s4] sm:$0xff]  }
0x22b4   :  { %1968 = vmatprep.subr.bf16.mxu0 %v2001_v49 }
0x22bc   :  { %v2108_v53 = vpop.eup %2107 }
0x22bd   :  { %v1371_v54 = vadd.f32 1.0, %v2108_v53  ;;  %v2110_v11 = vpop.eup %2109  ;;  %v1240_v53 = vrot.slane %v2484_v19, 4 }
0x22bf   :  { %2111 = vrcp.f32 %v1371_v54 }
0x22c9   :  { %v2112_v55 = vpop.eup %2111 }
0x22ca   :  { %v1375_v7 = vsel %vm2244_vm4, %v2110_v11, %v2112_v55 }
0x22cb   :  { %1378 = vrot.lane.b32.xlu1 %v1375_v7, %s2134_s18  ;;  %v1376_v13 = vmul.f32 %v1375_v7, %v1310_v41 }
0x233d   :  { %v1379_v57 = vpop.permute.xlu1 %1378 }
0x233e   :  { %v1381_v8 = vmul.f32 %v1379_v57, %v1375_v7 }
0x2340   :  { %1383 = vrot.lane.b32.xlu0 %v1381_v8, %s2135_s19 }
0x23b2   :  { %v1384_v56 = vpop.permute.xlu0 %1383 }
0x23b3   :  { %v1386_v58 = vadd.f32 %v1384_v56, %v1376_v13 }
0x23b5   :  { %2113 = vtanh.f32 %v1386_v58 }
0x23bf   :  { %v2114_v59 = vpop.eup %2113 }
0x23c0   :  { %1389 = vrot.lane.b32.xlu1 %v2114_v59, %s2134_s18  ;;  %v1743_v59 = vld [vmem:[%s2599_s5] ss:$0 sm:$0xff] }
0x2432   :  { %v1390_v60 = vpop.permute.xlu1 %1389 }
0x2433   :  { %v1392_v61 = vmul.f32 %v1390_v60, %v1375_v7 }
0x2435   :  { %v1393_v10 = vpack.c.bf16 %v1392_v61, %v1392_v61 }
0x2437   :  { %1401 = vrot.lane.b32.xlu0 %v1393_v10, %s2135_s19  ;;  %v1395_v47 = vrot.slane %v1393_v10, 4 }
0x24a9   :  { %v1402_v62 = vpop.permute.xlu0 %1401 }
0x24aa   :  { %1957 = vmatmul.mubr.msk.bf16.vlgmr.msra.gmra.mrb[32].mxu0 %vm86_vm0, %v1402_v62 }
0x24ab   :  { %1969 = vmatpush3.bf16.msra.mxu0 %v2001_v49 }
0x24ac   :  { %1970 = vmatprep.subr.bf16.mxu0 %v2002_v15 }
0x24af   :  { %1971 = vmatpush3.bf16.msra.mxu0 %v2002_v15 }
0x257d   :  { %v1440_v0 = vpop.f32.mrb[32].mxu0 }
0x257e   :  { %v1446_v1 = vadd.f32 %v1440_v0, %v914_v63  ;;  %v1958_v2 = vpop.f32.mrb[33].mxu0 }
0x257f   :  { %v1443_v42 = vpop.f32.mrb[34].mxu0 }
0x2580   :  { %v1739_v16 = vmul.f32 -1.442695, %v1446_v1  ;;  %v1959_v3 = vpop.f32.mrb[35].mxu0 }
0x2582   :  { %2115 = vpow2.f32 %v1739_v16 }
0x2583   :  { %2117 = vtanh.f32 %v1446_v1 }
0x258c   :  { %v2116_v4 = vpop.eup %2115 }
0x258d   :  { %v1450_v5 = vadd.f32 1.0, %v2116_v4  ;;  %v2118_v12 = vpop.eup %2117 }
0x258f   :  { %2119 = vrcp.f32 %v1450_v5 }
0x2599   :  { %v2120_v14 = vpop.eup %2119 }
0x259a   :  { %v1454_v18 = vsel %vm2244_vm4, %v2118_v12, %v2120_v14 }
0x259b   :  { %1457 = vrot.lane.b32.xlu1 %v1454_v18, %s2134_s18  ;;  %v1455_v21 = vmul.f32 %v1454_v18, %v1386_v58 }
0x260d   :  { %v1458_v9 = vpop.permute.xlu1 %1457 }
0x260e   :  { %v1460_v33 = vmul.f32 %v1458_v9, %v1454_v18 }
0x2610   :  { %1462 = vrot.lane.b32.xlu0 %v1460_v33, %s2135_s19 }
0x2682   :  { %v1463_v25 = vpop.permute.xlu0 %1462 }
0x2683   :  { %v1465_v27 = vadd.f32 %v1463_v25, %v1455_v21 }
0x2685   :  { %2121 = vtanh.f32 %v1465_v27 }
0x268f   :  { %v2122_v28 = vpop.eup %2121 }
0x2690   :  { %1468 = vrot.lane.b32.xlu1 %v2122_v28, %s2134_s18 }
0x2702   :  { %v1469_v29 = vpop.permute.xlu1 %1468 }
0x2703   :  { %v1471_v30 = vmul.f32 %v1469_v29, %v1454_v18 }
0x2705   :  { %v1472_v31 = vpack.c.bf16 %v1471_v30, %v1471_v30 }
0x2707   :  { %1474 = vrot.lane.b32.xlu0 %v1472_v31, %s2135_s19 }
0x2779   :  { %v1475_v32 = vpop.permute.xlu0 %1474 }
0x277a   :  { %1477 = vst.msk [vmem:[#allocation3 + $0x18] sm:$0xf] %vm259_vm5, %v1475_v32  ;;  %1965 = vmatmul.mubr.msk.bf16.vlgmr.msra.gmra.mrb[40].mxu1 %vm86_vm0, %v1475_v32 }
0x284d   :  { %v1516_v35 = vpop.f32.mrb[40].mxu1 }
0x284e   :  { %v1522_v24 = vadd.f32 %v1516_v35, %v917_v6  ;;  %v1966_v36 = vpop.f32.mrb[41].mxu1 }
0x284f   :  { %v1519_v38 = vpop.f32.mrb[42].mxu1 }
0x2850   :  { %v1741_v20 = vmul.f32 -1.442695, %v1522_v24  ;;  %v1967_v39 = vpop.f32.mrb[43].mxu1 }
0x2852   :  { %2123 = vpow2.f32 %v1741_v20 }
0x2853   :  { %2125 = vtanh.f32 %v1522_v24 }
0x285c   :  { %v2124_v40 = vpop.eup %2123 }
0x285d   :  { %v1526_v41 = vadd.f32 1.0, %v2124_v40  ;;  %v2126_v43 = vpop.eup %2125 }
0x285f   :  { %2127 = vrcp.f32 %v1526_v41 }
0x2869   :  { %v2128_v44 = vpop.eup %2127 }
0x286a   :  { %v1530_v45 = vsel %vm2244_vm4, %v2126_v43, %v2128_v44 }
0x286b   :  { %1533 = vrot.lane.b32.xlu1 %v1530_v45, %s2134_s18  ;;  %v1531_v48 = vmul.f32 %v1530_v45, %v1465_v27 }
0x28dd   :  { %v1534_v46 = vpop.permute.xlu1 %1533 }
0x28de   :  { %v1536_v26 = vmul.f32 %v1534_v46, %v1530_v45 }
0x28e0   :  { %1538 = vrot.lane.b32.xlu0 %v1536_v26, %s2135_s19 }
0x28e4   :  { %1086 = vrot.lane.b32.xlu0 %v1085_v34, %s2135_s19 }
0x28e8   :  { %1396 = vrot.lane.b32.xlu0 %v1395_v47, %s2135_s19 }
0x28ec   :  { %805 = vrot.lane.b32.xlu0 %v2432_v23, %s2135_s19 }
0x2952   :  { %v1539_v17 = vpop.permute.xlu0 %1538 }
0x2953   :  { %v1541_v37 = vadd.f32 %v1539_v17, %v1531_v48 }
0x2955   :  { %2129 = vtanh.f32 %v1541_v37 }
0x2956   :  { %v1087_v50 = vpop.permute.xlu0 %1086 }
0x2957   :  { %1089 = vst.msk [vmem:[#allocation3] sm:$0xf0] %vm337_vm6, %v1087_v50 }
0x295a   :  { %v1397_v51 = vpop.permute.xlu0 %1396 }
0x295b   :  { %1399 = vst.msk [vmem:[#allocation3 + $0x10] sm:$0xf0] %vm337_vm6, %v1397_v51 }
0x295e   :  { %v806_v23 = vpop.permute.xlu0 %805  ;;  %v1561_v22 = vld [vmem:[#allocation3] sm:$0xff] }
0x295f   :  { %v2130_v52 = vpop.eup %2129  ;;  %808 = vst.msk [vmem:[%s2598_s7] sm:$0xff] %vm86_vm0, %v806_v23  ;;  %1972 = vmatprep.mubr.msk.bf16.mxu0 %vm86_vm0, %v1561_v22 }
0x2960   :  { %1544 = vrot.lane.b32.xlu1 %v2130_v52, %s2134_s18 }
0x2962   :  { %v1563_v13 = vld [vmem:[#allocation3 + $0x10] sm:$0xff] }
0x2964   :  { %1241 = vrot.lane.b32.xlu1 %v1240_v53, %s2135_s19 }
0x29d2   :  { %v1545_v54 = vpop.permute.xlu1 %1544 }
0x29d3   :  { %v1547_v11 = vmul.f32 %v1545_v54, %v1530_v45 }
0x29d5   :  { %v1548_v55 = vpack.c.bf16 %v1547_v11, %v1547_v11 }
0x29d6   :  { %v1242_v7 = vpop.permute.xlu1 %1241 }
0x29d7   :  { %v1550_v57 = vrot.slane %v1548_v55, 4  ;;  %1244 = vst.msk [vmem:[#allocation3 + $0x8] sm:$0xf0] %vm337_vm6, %v1242_v7 }
0x29d9   :  { %1551 = vrot.lane.b32.xlu1 %v1550_v57, %s2135_s19 }
0x29dd   :  { %1556 = vrot.lane.b32.xlu1 %v1547_v11, %s2135_s19 }
0x29de   :  { %v1562_v8 = vld [vmem:[#allocation3 + $0x8] sm:$0xff] }
0x29df   :  { %1973 = vmatmul.mubr.msk.bf16.vlgmr.msra.gmra.mrb[36].mxu0 %vm86_vm0, %v1562_v8 }
0x29e0   :  { %1976 = vmatprep.mubr.msk.bf16.mxu0 %vm86_vm0, %v1563_v13 }
0x2a4b   :  { %v1552_v19 = vpop.permute.xlu1 %1551 }
0x2a4c   :  { %1554 = vst.msk [vmem:[#allocation3 + $0x18] sm:$0xf0] %vm337_vm6, %v1552_v19 }
0x2a4f   :  { %v1557_v56 = vpop.permute.xlu1 %1556 }
0x2a50   :  { %1742 = vst.msk [vmem:[%s2598_s7 + $0x8] sm:$0xff] %vm86_vm0, %v1557_v56 }
0x2a53   :  { %v1564_v58 = vld [vmem:[#allocation3 + $0x18] sm:$0xff] }
0x2a54   :  { %1977 = vmatmul.mubr.msk.bf16.gmra.mrb[40].mxu0 %vm86_vm0, %v1564_v58 }
0x2ab2   :  { %v1974_v60 = vpop.f32.mrb[36].mxu0 }
0x2ab3   :  { %v1643_v61 = vadd.f32 %v1974_v60, %v1743_v59  ;;  %v1634_v10 = vpop.f32.mrb[37].mxu0 }
0x2ab4   :  { %v1635_v62 = vadd.f32 %v1743_v59, %v1634_v10  ;;  %v1975_v63 = vpop.f32.mrb[38].mxu0 }
0x2ab5   :  { %1667 = vst [vmem:[%s2600_s6 + $0x10] sm:$0xff] %v1643_v61  ;;  %v1646_v0 = vadd.f32 %v1975_v63, %v1743_v59  ;;  %v1637_v1 = vpop.f32.mrb[39].mxu0 }
0x2ab6   :  { %1665 = vst [vmem:[%s2600_s6] sm:$0xff] %v1635_v62  ;;  %v1638_v2 = vadd.f32 %v1743_v59, %v1637_v1 }
0x2ab7   :  { %1668 = vst [vmem:[%s2600_s6 + $0x18] sm:$0xff] %v1646_v0 }
0x2ab8   :  { %1666 = vst [vmem:[%s2600_s6 + $0x8] sm:$0xff] %v1638_v2 }
0x2b27   :  { %v1978_v42 = vpop.f32.mrb[40].mxu0 }
0x2b28   :  { %v1659_v16 = vadd.f32 %v1978_v42, %v1743_v59  ;;  %v1650_v3 = vpop.f32.mrb[41].mxu0 }
0x2b29   :  { %v1651_v4 = vadd.f32 %v1743_v59, %v1650_v3  ;;  %v1979_v5 = vpop.f32.mrb[42].mxu0 }
0x2b2a   :  { %1671 = vst [vmem:[%s2600_s6 + $0x30] sm:$0xff] %v1659_v16  ;;  %v1662_v12 = vadd.f32 %v1979_v5, %v1743_v59  ;;  %v1653_v14 = vpop.f32.mrb[43].mxu0 }
0x2b2b   :  { %1669 = vst [vmem:[%s2600_s6 + $0x20] sm:$0xff] %v1651_v4  ;;  %v1654_v18 = vadd.f32 %v1743_v59, %v1653_v14 }
0x2b2c   :  { %1672 = vst [vmem:[%s2600_s6 + $0x38] sm:$0xff] %v1662_v12 }
0x2b2d   :  { %1670 = vst [vmem:[%s2600_s6 + $0x28] sm:$0xff] %v1654_v18 }

</bundles_post_ra>
